<compile_context>
chip_gen: v7x
topology: tpu7x:2x2x1
jax: 0.10.0
libtpu: 0.0.40
codegen_flags: <defaults>
</compile_context>

<pallas_src>
import functools

import jax
import jax.numpy as jnp
from jax.experimental import pallas as pl
from jax.experimental.pallas import tpu as pltpu

EPS = 1e-5

# MXU input dtype hook.  Keep float32 here for exact parity at toy shapes; flip to
# jnp.bfloat16 on v6e / v7x when scaling up (accumulation stays f32 via
# preferred_element_type), re-checking the tolerance.
MXU_DTYPE = jnp.float32


def _mm(a, b):
  """MXU matmul with f32 accumulation; single place to narrow inputs for v6e/v7x."""
  return jnp.dot(a.astype(MXU_DTYPE), b.astype(MXU_DTYPE),
                 preferred_element_type=jnp.float32)


def _gelu_tanh(x):
  # tanh-form GELU: lowers to EUP tanh (supported on all generations).
  c = 0.7978845608028654  # sqrt(2/pi)
  return 0.5 * x * (1.0 + jnp.tanh(c * (x + 0.044715 * x * x * x)))


def _layernorm(y, g, b):
  mu = jnp.mean(y, axis=-1, keepdims=True)
  var = jnp.mean((y - mu) ** 2, axis=-1, keepdims=True)
  return (y - mu) * jax.lax.rsqrt(var + EPS) * g + b


# ------------------------------ fused kernel -------------------------------- #

def _fused_transformer_kernel(
    x_ref, wproj_ref, wo_ref, ln1g_ref, ln1b_ref,
    w1_ref, b1_ref, w2_ref, b2_ref, ln2g_ref, ln2b_ref,
    o_ref, proj_ref, *, num_heads, t, e, dv, scale):
  m = e // t                      # K.view decomposition factor
  head_w = 2 * e + dv             # per-head column width inside the fused projection

  xb = x_ref[0]                                               # (t, e)

  # ---- fused Q/K/V projection for ALL heads: one MXU matmul, result in VMEM ----
  proj_ref[...] = _mm(xb, wproj_ref[...])                     # (t, H*(2e+dv))

  # ---- per-head attention (all intermediates stay in vregs/VMEM) ----
  z_heads = []
  for h in range(num_heads):
    base = h * head_w
    # scores = Q @ K.view(e, t)  ==  sum_s  Q[:, s::m] @ K[:, s*t:(s+1)*t]
    s_acc = _mm(proj_ref[:, base:base + t],
                proj_ref[:, base + e:base + e + t])
    for s in range(1, m):
      s_acc = s_acc + _mm(proj_ref[:, base + s * t:base + (s + 1) * t],
                          proj_ref[:, base + e + s * t:base + e + (s + 1) * t])
    s_acc = s_acc * scale
    # softmax over the *query* axis (torch nn.Softmax(1) on (b, t, t) scores)
    mx = jnp.max(s_acc, axis=0, keepdims=True)
    p = jnp.exp(s_acc - mx)
    inv = pl.reciprocal(jnp.sum(p, axis=0, keepdims=True), approx=True)
    a_h = p * inv                                             # (t, t)
    v_h = proj_ref[:, base + 2 * e:base + 2 * e + dv]         # (t, dv)
    z_heads.append(_mm(a_h, v_h))                             # (t, dv)

  # ---- Zt = Z.reshape(t, H*dv): raw row-major reshape of (H, t, dv),
  #      rebuilt from static row slices + concats (no vector reshape) ----
  tph = t // num_heads
  rows = []
  for a in range(t):
    h, la = a // tph, a % tph
    rows.append(jnp.concatenate(
        [z_heads[h][la * num_heads + r:la * num_heads + r + 1, :]
         for r in range(num_heads)], axis=1))                 # (1, H*dv)
  zt = jnp.concatenate(rows, axis=0)                          # (t, H*dv)

  # ---- output projection + residual + LayerNorm(ln1) ----
  z2 = _mm(zt, wo_ref[...])                                   # (t, e)
  z1 = _layernorm(xb + z2, ln1g_ref[...], ln1b_ref[...])      # (t, e)

  # ---- feed-forward on flattened tokens: Flatten -> Linear -> GELU x2 ----
  # flat(z1) @ W1  ==  sum_a  z1[a] @ W1[a*e:(a+1)*e]   (block-matmul identity)
  hid = b1_ref[...]                                           # (1, ff)
  for a in range(t):
    hid = hid + _mm(z1[a:a + 1, :], w1_ref[a * e:(a + 1) * e, :])
  hid = _gelu_tanh(hid)
  # (hid @ W2 + b2) unflattened row-by-row via W2 / b2 column blocks
  ffn_rows = []
  for a in range(t):
    o_a = _mm(hid, w2_ref[:, a * e:(a + 1) * e]) + b2_ref[:, a * e:(a + 1) * e]
    ffn_rows.append(_gelu_tanh(o_a))                          # (1, e)
  ffn = jnp.concatenate(ffn_rows, axis=0)                     # (t, e)

  # ---- residual + LayerNorm(ln2): the only HBM write of the whole block ----
  o_ref[0] = _layernorm(ffn + z1, ln2g_ref[...], ln2b_ref[...])


# -------------------------------- wrapper ----------------------------------- #

def transformer_forward(x, p):
  b, t, e = x.shape
  H, _, dk = p["WQ"].shape
  dv = p["WV"].shape[2]
  ff = p["W1"].shape[1]
  assert dk == e, "torch K.view(b, e, t) silently requires dk == embed_dim"
  assert e % t == 0, "reshape-free K.view decomposition needs num_tokens | embed_dim"
  assert t % H == 0, "reshape-free Zt assembly needs num_heads | num_tokens"
  m = e // t
  head_w = 2 * e + dv

  # One-time host-side weight packing:
  #  * WQ columns are interleave-permuted (s::m) so the in-kernel score matmul
  #    decomposes into m contiguous-slice matmuls == Q @ K.view(e, t) exactly.
  #  * WQperm | WK | WV of every head are concatenated into one (e, H*(2e+dv))
  #    matrix -> the whole Q/K/V projection is a single MXU matmul per batch element.
  wq_perm = jnp.concatenate([p["WQ"][:, :, s::m] for s in range(m)], axis=2)   # (H,e,e)
  wproj = jnp.concatenate(
      [jnp.concatenate([wq_perm[h], p["WK"][h], p["WV"][h]], axis=1)
       for h in range(H)], axis=1)                                             # (e, H*head_w)

  kernel = functools.partial(
      _fused_transformer_kernel,
      num_heads=H, t=t, e=e, dv=dv,
      scale=1.0 / (t ** 0.5))      # torch divides by K.size(1)**0.5 = sqrt(num_tokens)

  return pl.pallas_call(
      kernel,
      out_shape=jax.ShapeDtypeStruct((b, t, e), jnp.float32),
      grid=(b,),
      in_specs=[
          pl.BlockSpec((1, t, e), lambda i: (i, 0, 0)),          # x
          pl.BlockSpec((e, H * head_w), lambda i: (0, 0)),       # fused QKV weights
          pl.BlockSpec((H * dv, e), lambda i: (0, 0)),           # WO
          pl.BlockSpec((1, e), lambda i: (0, 0)),                # ln1 gamma
          pl.BlockSpec((1, e), lambda i: (0, 0)),                # ln1 beta
          pl.BlockSpec((t * e, ff), lambda i: (0, 0)),           # W1
          pl.BlockSpec((1, ff), lambda i: (0, 0)),               # b1
          pl.BlockSpec((ff, t * e), lambda i: (0, 0)),           # W2
          pl.BlockSpec((1, t * e), lambda i: (0, 0)),            # b2
          pl.BlockSpec((1, e), lambda i: (0, 0)),                # ln2 gamma
          pl.BlockSpec((1, e), lambda i: (0, 0)),                # ln2 beta
      ],
      out_specs=pl.BlockSpec((1, t, e), lambda i: (i, 0, 0)),
      scratch_shapes=[pltpu.VMEM((t, H * head_w), jnp.float32)],  # fused-projection buffer
      compiler_params=pltpu.CompilerParams(
          dimension_semantics=("parallel",),        # batch across v7x's 2 TCs
          vmem_limit_bytes=32 * 1024 * 1024),       # explicit budget (v7x-safe)
  )(x, wproj, p["WO"], p["ln1_g"], p["ln1_b"],
    p["W1"], p["b1"], p["W2"], p["b2"], p["ln2_g"], p["ln2_b"])


# --------------------------- pure-JAX reference ----------------------------- #

def _gelu_exact(x):
  # exact (erf) GELU, matching nn.GELU() default — used only outside the kernel.
  return 0.5 * x * (1.0 + jax.lax.erf(x * (2.0 ** -0.5)))


def reference_forward(x, p):
  b, t, e = x.shape
  H, _, dk = p["WQ"].shape
  dv = p["WV"].shape[2]
  Q = jnp.einsum("bte,hek->bhtk", x, p["WQ"])
  K = jnp.einsum("bte,hek->bhtk", x, p["WK"])
  V = jnp.einsum("bte,hek->bhtk", x, p["WV"])
  Kr = K.reshape(b, H, e, t)                      # torch K.view(b, e, t), per head
  s = jnp.einsum("bhqe,bhet->bhqt", Q, Kr) / (t ** 0.5)
  A = jax.nn.softmax(s, axis=2)                   # softmax over the query axis
  Z = jnp.einsum("bhqt,bhtd->bhqd", A, V)
  Zt = Z.reshape(b, t, H * dv)
  Z2 = jnp.einsum("btk,ke->bte", Zt, p["WO"])
  z1 = _layernorm(x + Z2, p["ln1_g"][0], p["ln1_b"][0])
  zf = z1.reshape(b, t * e)
  h = _gelu_exact(zf @ p["W1"] + p["b1"])
  o = _gelu_exact(h @ p["W2"] + p["b2"])
  return _layernorm(o.reshape(b, t, e) + z1, p["ln2_g"][0], p["ln2_b"][0])


# --------------------------------- main ------------------------------------ #

def make_params(key, t, e, H, ff):
  dk = dv = e                              # module defaults dk = dv = embed_dim
  ks = jax.random.split(key, 9)
  f32 = jnp.float32
  return {
      # attention (scaled for mild float32 numerics; deterministic synthetic init)
      "WQ": jax.random.normal(ks[0], (H, e, dk), f32) * (e ** -0.5),
      "WK": jax.random.normal(ks[1], (H, e, dk), f32) * (e ** -0.5),
      "WV": jax.random.normal(ks[2], (H, e, dv), f32) * (e ** -0.5),
      "WO": jax.random.normal(ks[3], (H * dv, e), f32) * ((H * dv) ** -0.5),
      # feed-forward (weights stored as (in, out) so kernel does x @ W)
      "W1": jax.random.normal(ks[4], (t * e, ff), f32) * ((t * e) ** -0.5),
      "b1": jax.random.normal(ks[5], (1, ff), f32) * 0.01,
      "W2": jax.random.normal(ks[6], (ff, t * e), f32) * (ff ** -0.5),
      "b2": jax.random.normal(ks[7], (1, t * e), f32) * 0.01,
      # LayerNorms (PyTorch default init: weight=1, bias=0)
      "ln1_g": jnp.ones((1, e), f32),
      "ln1_b": jnp.zeros((1, e), f32),
      "ln2_g": jnp.ones((1, e), f32),
      "ln2_b": jnp.zeros((1, e), f32),
  }


if __name__ == "__main__":
  B, T, E, HEADS, FF = 2, 8, 32, 2, 64
  key = jax.random.PRNGKey(0)
  kx, kp = jax.random.split(key)
  x = jax.random.normal(kx, (B, T, E), jnp.float32)
  params = make_params(kp, T, E, HEADS, FF)

  out = transformer_forward(x, params)
  out = jax.block_until_ready(out)

  ref = reference_forward(x, params)
  assert out.shape == (B, T, E), out.shape
  max_diff = float(jnp.max(jnp.abs(out - ref)))
  if not jnp.allclose(out, ref, rtol=2e-2, atol=2e-2):
    raise AssertionError(f"kernel/reference mismatch, max abs diff={max_diff}")
  print("KERNEL_OK")
</pallas_src>

<mosaic_0001>
module attributes {stable_mosaic.version = 11 : i64} {
  func.func @_fused_transformer_kernel(%arg0: i32, %arg1: memref<1x8x32xf32, #tpu.memory_space<vmem>>, %arg2: memref<32x192xf32, #tpu.memory_space<vmem>>, %arg3: memref<64x32xf32, #tpu.memory_space<vmem>>, %arg4: memref<1x32xf32, #tpu.memory_space<vmem>>, %arg5: memref<1x32xf32, #tpu.memory_space<vmem>>, %arg6: memref<256x64xf32, #tpu.memory_space<vmem>>, %arg7: memref<1x64xf32, #tpu.memory_space<vmem>>, %arg8: memref<64x256xf32, #tpu.memory_space<vmem>>, %arg9: memref<1x256xf32, #tpu.memory_space<vmem>>, %arg10: memref<1x32xf32, #tpu.memory_space<vmem>>, %arg11: memref<1x32xf32, #tpu.memory_space<vmem>>, %arg12: memref<1x8x32xf32, #tpu.memory_space<vmem>>, %arg13: memref<8x192xf32, #tpu.memory_space<vmem>>) attributes {dimension_semantics = [#tpu.dimension_semantics<parallel>], iteration_bounds = array<i64: 2>, scalar_prefetch = 0 : i64, scratch_operands = 1 : i64, tpu.core_type = #tpu.core_type<tc>, window_params = [{transform_indices = @transform_0, window_bounds = array<i64: 1, 8, 32>}, {pipeline_mode = #tpu.pipeline_mode<synchronous>, transform_indices = @transform_1, window_bounds = array<i64: 32, 192>}, {pipeline_mode = #tpu.pipeline_mode<synchronous>, transform_indices = @transform_2, window_bounds = array<i64: 64, 32>}, {pipeline_mode = #tpu.pipeline_mode<synchronous>, transform_indices = @transform_3, window_bounds = array<i64: 1, 32>}, {pipeline_mode = #tpu.pipeline_mode<synchronous>, transform_indices = @transform_4, window_bounds = array<i64: 1, 32>}, {pipeline_mode = #tpu.pipeline_mode<synchronous>, transform_indices = @transform_5, window_bounds = array<i64: 256, 64>}, {pipeline_mode = #tpu.pipeline_mode<synchronous>, transform_indices = @transform_6, window_bounds = array<i64: 1, 64>}, {pipeline_mode = #tpu.pipeline_mode<synchronous>, transform_indices = @transform_7, window_bounds = array<i64: 64, 256>}, {pipeline_mode = #tpu.pipeline_mode<synchronous>, transform_indices = @transform_8, window_bounds = array<i64: 1, 256>}, {pipeline_mode = #tpu.pipeline_mode<synchronous>, transform_indices = @transform_9, window_bounds = array<i64: 1, 32>}, {pipeline_mode = #tpu.pipeline_mode<synchronous>, transform_indices = @transform_10, window_bounds = array<i64: 1, 32>}, {transform_indices = @transform_11, window_bounds = array<i64: 1, 8, 32>}]} {
    %c0 = arith.constant 0 : index
    %c0_0 = arith.constant 0 : index
    %c0_1 = arith.constant 0 : index
    %0 = vector.load %arg1[%c0, %c0_0, %c0_1] : memref<1x8x32xf32, #tpu.memory_space<vmem>>, vector<1x8x32xf32>
    %1 = vector.shape_cast %0 : vector<1x8x32xf32> to vector<8x32xf32>
    %c0_2 = arith.constant 0 : index
    %c0_3 = arith.constant 0 : index
    %2 = vector.load %arg2[%c0_2, %c0_3] : memref<32x192xf32, #tpu.memory_space<vmem>>, vector<32x192xf32>
    %cst = arith.constant dense<0.000000e+00> : vector<8x192xf32>
    %3 = tpu.matmul %1, %2, %cst {dimension_numbers = #tpu.dot_dimension_numbers<[1], [0], [0], [1], [0, 0, 1, 1], [], []>} : vector<8x32xf32>, vector<32x192xf32>, vector<8x192xf32> -> vector<8x192xf32>
    %c0_4 = arith.constant 0 : index
    %c0_5 = arith.constant 0 : index
    %4 = vector.load %arg13[%c0_4, %c0_5] : memref<8x192xf32, #tpu.memory_space<vmem>>, vector<8x192xf32>
    tpu.vector_store %arg13[%c0_4, %c0_5], %3 {strides = array<i32>} : memref<8x192xf32, #tpu.memory_space<vmem>>, vector<8x192xf32>,
    %c0_6 = arith.constant 0 : index
    %c0_7 = arith.constant 0 : index
    %5 = vector.load %arg13[%c0_6, %c0_7] : memref<8x192xf32, #tpu.memory_space<vmem>>, vector<8x8xf32>
    %c0_8 = arith.constant 0 : index
    %c32 = arith.constant 32 : index
    %6 = vector.load %arg13[%c0_8, %c32] : memref<8x192xf32, #tpu.memory_space<vmem>>, vector<8x8xf32>
    %cst_9 = arith.constant dense<0.000000e+00> : vector<8x8xf32>
    %7 = tpu.matmul %5, %6, %cst_9 {dimension_numbers = #tpu.dot_dimension_numbers<[1], [0], [0], [1], [0, 0, 1, 1], [], []>} : vector<8x8xf32>, vector<8x8xf32>, vector<8x8xf32> -> vector<8x8xf32>
    %c0_10 = arith.constant 0 : index
    %c8 = arith.constant 8 : index
    %8 = vector.load %arg13[%c0_10, %c8] : memref<8x192xf32, #tpu.memory_space<vmem>>, vector<8x8xf32>
    %c0_11 = arith.constant 0 : index
    %c40 = arith.constant 40 : index
    %9 = vector.load %arg13[%c0_11, %c40] : memref<8x192xf32, #tpu.memory_space<vmem>>, vector<8x8xf32>
    %cst_12 = arith.constant dense<0.000000e+00> : vector<8x8xf32>
    %10 = tpu.matmul %8, %9, %cst_12 {dimension_numbers = #tpu.dot_dimension_numbers<[1], [0], [0], [1], [0, 0, 1, 1], [], []>} : vector<8x8xf32>, vector<8x8xf32>, vector<8x8xf32> -> vector<8x8xf32>
    %11 = arith.addf %7, %10 : vector<8x8xf32>
    %c0_13 = arith.constant 0 : index
    %c16 = arith.constant 16 : index
    %12 = vector.load %arg13[%c0_13, %c16] : memref<8x192xf32, #tpu.memory_space<vmem>>, vector<8x8xf32>
    %c0_14 = arith.constant 0 : index
    %c48 = arith.constant 48 : index
    %13 = vector.load %arg13[%c0_14, %c48] : memref<8x192xf32, #tpu.memory_space<vmem>>, vector<8x8xf32>
    %cst_15 = arith.constant dense<0.000000e+00> : vector<8x8xf32>
    %14 = tpu.matmul %12, %13, %cst_15 {dimension_numbers = #tpu.dot_dimension_numbers<[1], [0], [0], [1], [0, 0, 1, 1], [], []>} : vector<8x8xf32>, vector<8x8xf32>, vector<8x8xf32> -> vector<8x8xf32>
    %15 = arith.addf %11, %14 : vector<8x8xf32>
    %c0_16 = arith.constant 0 : index
    %c24 = arith.constant 24 : index
    %16 = vector.load %arg13[%c0_16, %c24] : memref<8x192xf32, #tpu.memory_space<vmem>>, vector<8x8xf32>
    %c0_17 = arith.constant 0 : index
    %c56 = arith.constant 56 : index
    %17 = vector.load %arg13[%c0_17, %c56] : memref<8x192xf32, #tpu.memory_space<vmem>>, vector<8x8xf32>
    %cst_18 = arith.constant dense<0.000000e+00> : vector<8x8xf32>
    %18 = tpu.matmul %16, %17, %cst_18 {dimension_numbers = #tpu.dot_dimension_numbers<[1], [0], [0], [1], [0, 0, 1, 1], [], []>} : vector<8x8xf32>, vector<8x8xf32>, vector<8x8xf32> -> vector<8x8xf32>
    %19 = arith.addf %15, %18 : vector<8x8xf32>
    %cst_19 = arith.constant 0.353553385 : f32
    %20 = vector.broadcast %cst_19 : f32 to vector<8x8xf32>
    %21 = arith.mulf %19, %20 : vector<8x8xf32>
    %cst_20 = arith.constant dense<0xFF800000> : vector<8xf32>
    %22 = vector.multi_reduction <maximumf>, %21, %cst_20 [0] : vector<8x8xf32> to vector<8xf32>
    %23 = vector.shape_cast %22 : vector<8xf32> to vector<1x8xf32>
    %24 = vector.broadcast %23 : vector<1x8xf32> to vector<8x8xf32>
    %25 = arith.subf %21, %24 : vector<8x8xf32>
    %26 = math.exp %25 : vector<8x8xf32>
    %cst_21 = arith.constant dense<0.000000e+00> : vector<8xf32>
    %27 = vector.multi_reduction <add>, %26, %cst_21 [0] : vector<8x8xf32> to vector<8xf32>
    %28 = vector.shape_cast %27 : vector<8xf32> to vector<1x8xf32>
    %29 = tpu.reciprocal %28 {approx = true} : vector<1x8xf32> -> vector<1x8xf32>
    %30 = vector.broadcast %29 : vector<1x8xf32> to vector<8x8xf32>
    %31 = arith.mulf %26, %30 : vector<8x8xf32>
    %c0_22 = arith.constant 0 : index
    %c64 = arith.constant 64 : index
    %32 = vector.load %arg13[%c0_22, %c64] : memref<8x192xf32, #tpu.memory_space<vmem>>, vector<8x32xf32>
    %cst_23 = arith.constant dense<0.000000e+00> : vector<8x32xf32>
    %33 = tpu.matmul %31, %32, %cst_23 {dimension_numbers = #tpu.dot_dimension_numbers<[1], [0], [0], [1], [0, 0, 1, 1], [], []>} : vector<8x8xf32>, vector<8x32xf32>, vector<8x32xf32> -> vector<8x32xf32>
    %c0_24 = arith.constant 0 : index
    %c96 = arith.constant 96 : index
    %34 = vector.load %arg13[%c0_24, %c96] : memref<8x192xf32, #tpu.memory_space<vmem>>, vector<8x8xf32>
    %c0_25 = arith.constant 0 : index
    %c128 = arith.constant 128 : index
    %35 = vector.load %arg13[%c0_25, %c128] : memref<8x192xf32, #tpu.memory_space<vmem>>, vector<8x8xf32>
    %cst_26 = arith.constant dense<0.000000e+00> : vector<8x8xf32>
    %36 = tpu.matmul %34, %35, %cst_26 {dimension_numbers = #tpu.dot_dimension_numbers<[1], [0], [0], [1], [0, 0, 1, 1], [], []>} : vector<8x8xf32>, vector<8x8xf32>, vector<8x8xf32> -> vector<8x8xf32>
    %c0_27 = arith.constant 0 : index
    %c104 = arith.constant 104 : index
    %37 = vector.load %arg13[%c0_27, %c104] : memref<8x192xf32, #tpu.memory_space<vmem>>, vector<8x8xf32>
    %c0_28 = arith.constant 0 : index
    %c136 = arith.constant 136 : index
    %38 = vector.load %arg13[%c0_28, %c136] : memref<8x192xf32, #tpu.memory_space<vmem>>, vector<8x8xf32>
    %cst_29 = arith.constant dense<0.000000e+00> : vector<8x8xf32>
    %39 = tpu.matmul %37, %38, %cst_29 {dimension_numbers = #tpu.dot_dimension_numbers<[1], [0], [0], [1], [0, 0, 1, 1], [], []>} : vector<8x8xf32>, vector<8x8xf32>, vector<8x8xf32> -> vector<8x8xf32>
    %40 = arith.addf %36, %39 : vector<8x8xf32>
    %c0_30 = arith.constant 0 : index
    %c112 = arith.constant 112 : index
    %41 = vector.load %arg13[%c0_30, %c112] : memref<8x192xf32, #tpu.memory_space<vmem>>, vector<8x8xf32>
    %c0_31 = arith.constant 0 : index
    %c144 = arith.constant 144 : index
    %42 = vector.load %arg13[%c0_31, %c144] : memref<8x192xf32, #tpu.memory_space<vmem>>, vector<8x8xf32>
    %cst_32 = arith.constant dense<0.000000e+00> : vector<8x8xf32>
    %43 = tpu.matmul %41, %42, %cst_32 {dimension_numbers = #tpu.dot_dimension_numbers<[1], [0], [0], [1], [0, 0, 1, 1], [], []>} : vector<8x8xf32>, vector<8x8xf32>, vector<8x8xf32> -> vector<8x8xf32>
    %44 = arith.addf %40, %43 : vector<8x8xf32>
    %c0_33 = arith.constant 0 : index
    %c120 = arith.constant 120 : index
    %45 = vector.load %arg13[%c0_33, %c120] : memref<8x192xf32, #tpu.memory_space<vmem>>, vector<8x8xf32>
    %c0_34 = arith.constant 0 : index
    %c152 = arith.constant 152 : index
    %46 = vector.load %arg13[%c0_34, %c152] : memref<8x192xf32, #tpu.memory_space<vmem>>, vector<8x8xf32>
    %cst_35 = arith.constant dense<0.000000e+00> : vector<8x8xf32>
    %47 = tpu.matmul %45, %46, %cst_35 {dimension_numbers = #tpu.dot_dimension_numbers<[1], [0], [0], [1], [0, 0, 1, 1], [], []>} : vector<8x8xf32>, vector<8x8xf32>, vector<8x8xf32> -> vector<8x8xf32>
    %48 = arith.addf %44, %47 : vector<8x8xf32>
    %cst_36 = arith.constant 0.353553385 : f32
    %49 = vector.broadcast %cst_36 : f32 to vector<8x8xf32>
    %50 = arith.mulf %48, %49 : vector<8x8xf32>
    %cst_37 = arith.constant dense<0xFF800000> : vector<8xf32>
    %51 = vector.multi_reduction <maximumf>, %50, %cst_37 [0] : vector<8x8xf32> to vector<8xf32>
    %52 = vector.shape_cast %51 : vector<8xf32> to vector<1x8xf32>
    %53 = vector.broadcast %52 : vector<1x8xf32> to vector<8x8xf32>
    %54 = arith.subf %50, %53 : vector<8x8xf32>
    %55 = math.exp %54 : vector<8x8xf32>
    %cst_38 = arith.constant dense<0.000000e+00> : vector<8xf32>
    %56 = vector.multi_reduction <add>, %55, %cst_38 [0] : vector<8x8xf32> to vector<8xf32>
    %57 = vector.shape_cast %56 : vector<8xf32> to vector<1x8xf32>
    %58 = tpu.reciprocal %57 {approx = true} : vector<1x8xf32> -> vector<1x8xf32>
    %59 = vector.broadcast %58 : vector<1x8xf32> to vector<8x8xf32>
    %60 = arith.mulf %55, %59 : vector<8x8xf32>
    %c0_39 = arith.constant 0 : index
    %c160 = arith.constant 160 : index
    %61 = vector.load %arg13[%c0_39, %c160] : memref<8x192xf32, #tpu.memory_space<vmem>>, vector<8x32xf32>
    %cst_40 = arith.constant dense<0.000000e+00> : vector<8x32xf32>
    %62 = tpu.matmul %60, %61, %cst_40 {dimension_numbers = #tpu.dot_dimension_numbers<[1], [0], [0], [1], [0, 0, 1, 1], [], []>} : vector<8x8xf32>, vector<8x32xf32>, vector<8x32xf32> -> vector<8x32xf32>
    %63 = vector.extract_strided_slice %33 {offsets = [0, 0], sizes = [1, 32], strides = [1, 1]} : vector<8x32xf32> to vector<1x32xf32>
    %64 = vector.extract_strided_slice %33 {offsets = [1, 0], sizes = [1, 32], strides = [1, 1]} : vector<8x32xf32> to vector<1x32xf32>
    %65 = tpu.concatenate %63, %64 in 1 : vector<1x32xf32>, vector<1x32xf32> -> vector<1x64xf32>
    %66 = vector.extract_strided_slice %33 {offsets = [2, 0], sizes = [1, 32], strides = [1, 1]} : vector<8x32xf32> to vector<1x32xf32>
    %67 = vector.extract_strided_slice %33 {offsets = [3, 0], sizes = [1, 32], strides = [1, 1]} : vector<8x32xf32> to vector<1x32xf32>
    %68 = tpu.concatenate %66, %67 in 1 : vector<1x32xf32>, vector<1x32xf32> -> vector<1x64xf32>
    %69 = vector.extract_strided_slice %33 {offsets = [4, 0], sizes = [1, 32], strides = [1, 1]} : vector<8x32xf32> to vector<1x32xf32>
    %70 = vector.extract_strided_slice %33 {offsets = [5, 0], sizes = [1, 32], strides = [1, 1]} : vector<8x32xf32> to vector<1x32xf32>
    %71 = tpu.concatenate %69, %70 in 1 : vector<1x32xf32>, vector<1x32xf32> -> vector<1x64xf32>
    %72 = vector.extract_strided_slice %33 {offsets = [6, 0], sizes = [1, 32], strides = [1, 1]} : vector<8x32xf32> to vector<1x32xf32>
    %73 = vector.extract_strided_slice %33 {offsets = [7, 0], sizes = [1, 32], strides = [1, 1]} : vector<8x32xf32> to vector<1x32xf32>
    %74 = tpu.concatenate %72, %73 in 1 : vector<1x32xf32>, vector<1x32xf32> -> vector<1x64xf32>
    %75 = vector.extract_strided_slice %62 {offsets = [0, 0], sizes = [1, 32], strides = [1, 1]} : vector<8x32xf32> to vector<1x32xf32>
    %76 = vector.extract_strided_slice %62 {offsets = [1, 0], sizes = [1, 32], strides = [1, 1]} : vector<8x32xf32> to vector<1x32xf32>
    %77 = tpu.concatenate %75, %76 in 1 : vector<1x32xf32>, vector<1x32xf32> -> vector<1x64xf32>
    %78 = vector.extract_strided_slice %62 {offsets = [2, 0], sizes = [1, 32], strides = [1, 1]} : vector<8x32xf32> to vector<1x32xf32>
    %79 = vector.extract_strided_slice %62 {offsets = [3, 0], sizes = [1, 32], strides = [1, 1]} : vector<8x32xf32> to vector<1x32xf32>
    %80 = tpu.concatenate %78, %79 in 1 : vector<1x32xf32>, vector<1x32xf32> -> vector<1x64xf32>
    %81 = vector.extract_strided_slice %62 {offsets = [4, 0], sizes = [1, 32], strides = [1, 1]} : vector<8x32xf32> to vector<1x32xf32>
    %82 = vector.extract_strided_slice %62 {offsets = [5, 0], sizes = [1, 32], strides = [1, 1]} : vector<8x32xf32> to vector<1x32xf32>
    %83 = tpu.concatenate %81, %82 in 1 : vector<1x32xf32>, vector<1x32xf32> -> vector<1x64xf32>
    %84 = vector.extract_strided_slice %62 {offsets = [6, 0], sizes = [1, 32], strides = [1, 1]} : vector<8x32xf32> to vector<1x32xf32>
    %85 = vector.extract_strided_slice %62 {offsets = [7, 0], sizes = [1, 32], strides = [1, 1]} : vector<8x32xf32> to vector<1x32xf32>
    %86 = tpu.concatenate %84, %85 in 1 : vector<1x32xf32>, vector<1x32xf32> -> vector<1x64xf32>
    %87 = tpu.concatenate %65, %68, %71, %74, %77, %80, %83, %86 in 0 : vector<1x64xf32>, vector<1x64xf32>, vector<1x64xf32>, vector<1x64xf32>, vector<1x64xf32>, vector<1x64xf32>, vector<1x64xf32>, vector<1x64xf32> -> vector<8x64xf32>
    %c0_41 = arith.constant 0 : index
    %c0_42 = arith.constant 0 : index
    %88 = vector.load %arg3[%c0_41, %c0_42] : memref<64x32xf32, #tpu.memory_space<vmem>>, vector<64x32xf32>
    %cst_43 = arith.constant dense<0.000000e+00> : vector<8x32xf32>
    %89 = tpu.matmul %87, %88, %cst_43 {dimension_numbers = #tpu.dot_dimension_numbers<[1], [0], [0], [1], [0, 0, 1, 1], [], []>} : vector<8x64xf32>, vector<64x32xf32>, vector<8x32xf32> -> vector<8x32xf32>
    %90 = arith.addf %1, %89 : vector<8x32xf32>
    %c0_44 = arith.constant 0 : index
    %c0_45 = arith.constant 0 : index
    %91 = vector.load %arg4[%c0_44, %c0_45] : memref<1x32xf32, #tpu.memory_space<vmem>>, vector<1x32xf32>
    %c0_46 = arith.constant 0 : index
    %c0_47 = arith.constant 0 : index
    %92 = vector.load %arg5[%c0_46, %c0_47] : memref<1x32xf32, #tpu.memory_space<vmem>>, vector<1x32xf32>
    %cst_48 = arith.constant dense<0.000000e+00> : vector<8xf32>
    %93 = vector.multi_reduction <add>, %90, %cst_48 [1] : vector<8x32xf32> to vector<8xf32>
    %94 = vector.shape_cast %93 : vector<8xf32> to vector<8x1xf32>
    %cst_49 = arith.constant 3.200000e+01 : f32
    %95 = vector.broadcast %cst_49 : f32 to vector<8x1xf32>
    %96 = arith.divf %94, %95 : vector<8x1xf32>
    %97 = vector.broadcast %96 : vector<8x1xf32> to vector<8x32xf32>
    %98 = arith.subf %90, %97 : vector<8x32xf32>
    %99 = arith.mulf %98, %98 : vector<8x32xf32>
    %cst_50 = arith.constant dense<0.000000e+00> : vector<8xf32>
    %100 = vector.multi_reduction <add>, %99, %cst_50 [1] : vector<8x32xf32> to vector<8xf32>
    %101 = vector.shape_cast %100 : vector<8xf32> to vector<8x1xf32>
    %cst_51 = arith.constant 3.200000e+01 : f32
    %102 = vector.broadcast %cst_51 : f32 to vector<8x1xf32>
    %103 = arith.divf %101, %102 : vector<8x1xf32>
    %104 = vector.broadcast %96 : vector<8x1xf32> to vector<8x32xf32>
    %105 = arith.subf %90, %104 : vector<8x32xf32>
    %cst_52 = arith.constant 9.99999974E-6 : f32
    %106 = vector.broadcast %cst_52 : f32 to vector<8x1xf32>
    %107 = arith.addf %103, %106 : vector<8x1xf32>
    %108 = math.rsqrt %107 : vector<8x1xf32>
    %109 = vector.broadcast %108 : vector<8x1xf32> to vector<8x32xf32>
    %110 = arith.mulf %105, %109 : vector<8x32xf32>
    %111 = vector.broadcast %91 : vector<1x32xf32> to vector<8x32xf32>
    %112 = arith.mulf %110, %111 : vector<8x32xf32>
    %113 = vector.broadcast %92 : vector<1x32xf32> to vector<8x32xf32>
    %114 = arith.addf %112, %113 : vector<8x32xf32>
    %c0_53 = arith.constant 0 : index
    %c0_54 = arith.constant 0 : index
    %115 = vector.load %arg7[%c0_53, %c0_54] : memref<1x64xf32, #tpu.memory_space<vmem>>, vector<1x64xf32>
    %116 = vector.extract_strided_slice %114 {offsets = [0, 0], sizes = [1, 32], strides = [1, 1]} : vector<8x32xf32> to vector<1x32xf32>
    %c0_55 = arith.constant 0 : index
    %c0_56 = arith.constant 0 : index
    %117 = vector.load %arg6[%c0_55, %c0_56] : memref<256x64xf32, #tpu.memory_space<vmem>>, vector<32x64xf32>
    %cst_57 = arith.constant dense<0.000000e+00> : vector<1x64xf32>
    %118 = tpu.matmul %116, %117, %cst_57 {dimension_numbers = #tpu.dot_dimension_numbers<[1], [0], [0], [1], [0, 0, 1, 1], [], []>} : vector<1x32xf32>, vector<32x64xf32>, vector<1x64xf32> -> vector<1x64xf32>
    %119 = arith.addf %115, %118 : vector<1x64xf32>
    %120 = vector.extract_strided_slice %114 {offsets = [1, 0], sizes = [1, 32], strides = [1, 1]} : vector<8x32xf32> to vector<1x32xf32>
    %c32_58 = arith.constant 32 : index
    %c0_59 = arith.constant 0 : index
    %121 = vector.load %arg6[%c32_58, %c0_59] : memref<256x64xf32, #tpu.memory_space<vmem>>, vector<32x64xf32>
    %cst_60 = arith.constant dense<0.000000e+00> : vector<1x64xf32>
    %122 = tpu.matmul %120, %121, %cst_60 {dimension_numbers = #tpu.dot_dimension_numbers<[1], [0], [0], [1], [0, 0, 1, 1], [], []>} : vector<1x32xf32>, vector<32x64xf32>, vector<1x64xf32> -> vector<1x64xf32>
    %123 = arith.addf %119, %122 : vector<1x64xf32>
    %124 = vector.extract_strided_slice %114 {offsets = [2, 0], sizes = [1, 32], strides = [1, 1]} : vector<8x32xf32> to vector<1x32xf32>
    %c64_61 = arith.constant 64 : index
    %c0_62 = arith.constant 0 : index
    %125 = vector.load %arg6[%c64_61, %c0_62] : memref<256x64xf32, #tpu.memory_space<vmem>>, vector<32x64xf32>
    %cst_63 = arith.constant dense<0.000000e+00> : vector<1x64xf32>
    %126 = tpu.matmul %124, %125, %cst_63 {dimension_numbers = #tpu.dot_dimension_numbers<[1], [0], [0], [1], [0, 0, 1, 1], [], []>} : vector<1x32xf32>, vector<32x64xf32>, vector<1x64xf32> -> vector<1x64xf32>
    %127 = arith.addf %123, %126 : vector<1x64xf32>
    %128 = vector.extract_strided_slice %114 {offsets = [3, 0], sizes = [1, 32], strides = [1, 1]} : vector<8x32xf32> to vector<1x32xf32>
    %c96_64 = arith.constant 96 : index
    %c0_65 = arith.constant 0 : index
    %129 = vector.load %arg6[%c96_64, %c0_65] : memref<256x64xf32, #tpu.memory_space<vmem>>, vector<32x64xf32>
    %cst_66 = arith.constant dense<0.000000e+00> : vector<1x64xf32>
    %130 = tpu.matmul %128, %129, %cst_66 {dimension_numbers = #tpu.dot_dimension_numbers<[1], [0], [0], [1], [0, 0, 1, 1], [], []>} : vector<1x32xf32>, vector<32x64xf32>, vector<1x64xf32> -> vector<1x64xf32>
    %131 = arith.addf %127, %130 : vector<1x64xf32>
    %132 = vector.extract_strided_slice %114 {offsets = [4, 0], sizes = [1, 32], strides = [1, 1]} : vector<8x32xf32> to vector<1x32xf32>
    %c128_67 = arith.constant 128 : index
    %c0_68 = arith.constant 0 : index
    %133 = vector.load %arg6[%c128_67, %c0_68] : memref<256x64xf32, #tpu.memory_space<vmem>>, vector<32x64xf32>
    %cst_69 = arith.constant dense<0.000000e+00> : vector<1x64xf32>
    %134 = tpu.matmul %132, %133, %cst_69 {dimension_numbers = #tpu.dot_dimension_numbers<[1], [0], [0], [1], [0, 0, 1, 1], [], []>} : vector<1x32xf32>, vector<32x64xf32>, vector<1x64xf32> -> vector<1x64xf32>
    %135 = arith.addf %131, %134 : vector<1x64xf32>
    %136 = vector.extract_strided_slice %114 {offsets = [5, 0], sizes = [1, 32], strides = [1, 1]} : vector<8x32xf32> to vector<1x32xf32>
    %c160_70 = arith.constant 160 : index
    %c0_71 = arith.constant 0 : index
    %137 = vector.load %arg6[%c160_70, %c0_71] : memref<256x64xf32, #tpu.memory_space<vmem>>, vector<32x64xf32>
    %cst_72 = arith.constant dense<0.000000e+00> : vector<1x64xf32>
    %138 = tpu.matmul %136, %137, %cst_72 {dimension_numbers = #tpu.dot_dimension_numbers<[1], [0], [0], [1], [0, 0, 1, 1], [], []>} : vector<1x32xf32>, vector<32x64xf32>, vector<1x64xf32> -> vector<1x64xf32>
    %139 = arith.addf %135, %138 : vector<1x64xf32>
    %140 = vector.extract_strided_slice %114 {offsets = [6, 0], sizes = [1, 32], strides = [1, 1]} : vector<8x32xf32> to vector<1x32xf32>
    %c192 = arith.constant 192 : index
    %c0_73 = arith.constant 0 : index
    %141 = vector.load %arg6[%c192, %c0_73] : memref<256x64xf32, #tpu.memory_space<vmem>>, vector<32x64xf32>
    %cst_74 = arith.constant dense<0.000000e+00> : vector<1x64xf32>
    %142 = tpu.matmul %140, %141, %cst_74 {dimension_numbers = #tpu.dot_dimension_numbers<[1], [0], [0], [1], [0, 0, 1, 1], [], []>} : vector<1x32xf32>, vector<32x64xf32>, vector<1x64xf32> -> vector<1x64xf32>
    %143 = arith.addf %139, %142 : vector<1x64xf32>
    %144 = vector.extract_strided_slice %114 {offsets = [7, 0], sizes = [1, 32], strides = [1, 1]} : vector<8x32xf32> to vector<1x32xf32>
    %c224 = arith.constant 224 : index
    %c0_75 = arith.constant 0 : index
    %145 = vector.load %arg6[%c224, %c0_75] : memref<256x64xf32, #tpu.memory_space<vmem>>, vector<32x64xf32>
    %cst_76 = arith.constant dense<0.000000e+00> : vector<1x64xf32>
    %146 = tpu.matmul %144, %145, %cst_76 {dimension_numbers = #tpu.dot_dimension_numbers<[1], [0], [0], [1], [0, 0, 1, 1], [], []>} : vector<1x32xf32>, vector<32x64xf32>, vector<1x64xf32> -> vector<1x64xf32>
    %147 = arith.addf %143, %146 : vector<1x64xf32>
    %cst_77 = arith.constant 5.000000e-01 : f32
    %148 = vector.broadcast %cst_77 : f32 to vector<1x64xf32>
    %149 = arith.mulf %148, %147 : vector<1x64xf32>
    %cst_78 = arith.constant 4.471500e-02 : f32
    %150 = vector.broadcast %cst_78 : f32 to vector<1x64xf32>
    %151 = arith.mulf %150, %147 : vector<1x64xf32>
    %152 = arith.mulf %151, %147 : vector<1x64xf32>
    %153 = arith.mulf %152, %147 : vector<1x64xf32>
    %154 = arith.addf %147, %153 : vector<1x64xf32>
    %cst_79 = arith.constant 0.797884583 : f32
    %155 = vector.broadcast %cst_79 : f32 to vector<1x64xf32>
    %156 = arith.mulf %155, %154 : vector<1x64xf32>
    %157 = math.tanh %156 : vector<1x64xf32>
    %cst_80 = arith.constant 1.000000e+00 : f32
    %158 = vector.broadcast %cst_80 : f32 to vector<1x64xf32>
    %159 = arith.addf %158, %157 : vector<1x64xf32>
    %160 = arith.mulf %149, %159 : vector<1x64xf32>
    %c0_81 = arith.constant 0 : index
    %c0_82 = arith.constant 0 : index
    %161 = vector.load %arg8[%c0_81, %c0_82] : memref<64x256xf32, #tpu.memory_space<vmem>>, vector<64x32xf32>
    %cst_83 = arith.constant dense<0.000000e+00> : vector<1x32xf32>
    %162 = tpu.matmul %160, %161, %cst_83 {dimension_numbers = #tpu.dot_dimension_numbers<[1], [0], [0], [1], [0, 0, 1, 1], [], []>} : vector<1x64xf32>, vector<64x32xf32>, vector<1x32xf32> -> vector<1x32xf32>
    %c0_84 = arith.constant 0 : index
    %c0_85 = arith.constant 0 : index
    %163 = vector.load %arg9[%c0_84, %c0_85] : memref<1x256xf32, #tpu.memory_space<vmem>>, vector<1x32xf32>
    %164 = arith.addf %162, %163 : vector<1x32xf32>
    %cst_86 = arith.constant 5.000000e-01 : f32
    %165 = vector.broadcast %cst_86 : f32 to vector<1x32xf32>
    %166 = arith.mulf %165, %164 : vector<1x32xf32>
    %cst_87 = arith.constant 4.471500e-02 : f32
    %167 = vector.broadcast %cst_87 : f32 to vector<1x32xf32>
    %168 = arith.mulf %167, %164 : vector<1x32xf32>
    %169 = arith.mulf %168, %164 : vector<1x32xf32>
    %170 = arith.mulf %169, %164 : vector<1x32xf32>
    %171 = arith.addf %164, %170 : vector<1x32xf32>
    %cst_88 = arith.constant 0.797884583 : f32
    %172 = vector.broadcast %cst_88 : f32 to vector<1x32xf32>
    %173 = arith.mulf %172, %171 : vector<1x32xf32>
    %174 = math.tanh %173 : vector<1x32xf32>
    %cst_89 = arith.constant 1.000000e+00 : f32
    %175 = vector.broadcast %cst_89 : f32 to vector<1x32xf32>
    %176 = arith.addf %175, %174 : vector<1x32xf32>
    %177 = arith.mulf %166, %176 : vector<1x32xf32>
    %c0_90 = arith.constant 0 : index
    %c32_91 = arith.constant 32 : index
    %178 = vector.load %arg8[%c0_90, %c32_91] : memref<64x256xf32, #tpu.memory_space<vmem>>, vector<64x32xf32>
    %cst_92 = arith.constant dense<0.000000e+00> : vector<1x32xf32>
    %179 = tpu.matmul %160, %178, %cst_92 {dimension_numbers = #tpu.dot_dimension_numbers<[1], [0], [0], [1], [0, 0, 1, 1], [], []>} : vector<1x64xf32>, vector<64x32xf32>, vector<1x32xf32> -> vector<1x32xf32>
    %c0_93 = arith.constant 0 : index
    %c32_94 = arith.constant 32 : index
    %180 = vector.load %arg9[%c0_93, %c32_94] : memref<1x256xf32, #tpu.memory_space<vmem>>, vector<1x32xf32>
    %181 = arith.addf %179, %180 : vector<1x32xf32>
    %cst_95 = arith.constant 5.000000e-01 : f32
    %182 = vector.broadcast %cst_95 : f32 to vector<1x32xf32>
    %183 = arith.mulf %182, %181 : vector<1x32xf32>
    %cst_96 = arith.constant 4.471500e-02 : f32
    %184 = vector.broadcast %cst_96 : f32 to vector<1x32xf32>
    %185 = arith.mulf %184, %181 : vector<1x32xf32>
    %186 = arith.mulf %185, %181 : vector<1x32xf32>
    %187 = arith.mulf %186, %181 : vector<1x32xf32>
    %188 = arith.addf %181, %187 : vector<1x32xf32>
    %cst_97 = arith.constant 0.797884583 : f32
    %189 = vector.broadcast %cst_97 : f32 to vector<1x32xf32>
    %190 = arith.mulf %189, %188 : vector<1x32xf32>
    %191 = math.tanh %190 : vector<1x32xf32>
    %cst_98 = arith.constant 1.000000e+00 : f32
    %192 = vector.broadcast %cst_98 : f32 to vector<1x32xf32>
    %193 = arith.addf %192, %191 : vector<1x32xf32>
    %194 = arith.mulf %183, %193 : vector<1x32xf32>
    %c0_99 = arith.constant 0 : index
    %c64_100 = arith.constant 64 : index
    %195 = vector.load %arg8[%c0_99, %c64_100] : memref<64x256xf32, #tpu.memory_space<vmem>>, vector<64x32xf32>
    %cst_101 = arith.constant dense<0.000000e+00> : vector<1x32xf32>
    %196 = tpu.matmul %160, %195, %cst_101 {dimension_numbers = #tpu.dot_dimension_numbers<[1], [0], [0], [1], [0, 0, 1, 1], [], []>} : vector<1x64xf32>, vector<64x32xf32>, vector<1x32xf32> -> vector<1x32xf32>
    %c0_102 = arith.constant 0 : index
    %c64_103 = arith.constant 64 : index
    %197 = vector.load %arg9[%c0_102, %c64_103] : memref<1x256xf32, #tpu.memory_space<vmem>>, vector<1x32xf32>
    %198 = arith.addf %196, %197 : vector<1x32xf32>
    %cst_104 = arith.constant 5.000000e-01 : f32
    %199 = vector.broadcast %cst_104 : f32 to vector<1x32xf32>
    %200 = arith.mulf %199, %198 : vector<1x32xf32>
    %cst_105 = arith.constant 4.471500e-02 : f32
    %201 = vector.broadcast %cst_105 : f32 to vector<1x32xf32>
    %202 = arith.mulf %201, %198 : vector<1x32xf32>
    %203 = arith.mulf %202, %198 : vector<1x32xf32>
    %204 = arith.mulf %203, %198 : vector<1x32xf32>
    %205 = arith.addf %198, %204 : vector<1x32xf32>
    %cst_106 = arith.constant 0.797884583 : f32
    %206 = vector.broadcast %cst_106 : f32 to vector<1x32xf32>
    %207 = arith.mulf %206, %205 : vector<1x32xf32>
    %208 = math.tanh %207 : vector<1x32xf32>
    %cst_107 = arith.constant 1.000000e+00 : f32
    %209 = vector.broadcast %cst_107 : f32 to vector<1x32xf32>
    %210 = arith.addf %209, %208 : vector<1x32xf32>
    %211 = arith.mulf %200, %210 : vector<1x32xf32>
    %c0_108 = arith.constant 0 : index
    %c96_109 = arith.constant 96 : index
    %212 = vector.load %arg8[%c0_108, %c96_109] : memref<64x256xf32, #tpu.memory_space<vmem>>, vector<64x32xf32>
    %cst_110 = arith.constant dense<0.000000e+00> : vector<1x32xf32>
    %213 = tpu.matmul %160, %212, %cst_110 {dimension_numbers = #tpu.dot_dimension_numbers<[1], [0], [0], [1], [0, 0, 1, 1], [], []>} : vector<1x64xf32>, vector<64x32xf32>, vector<1x32xf32> -> vector<1x32xf32>
    %c0_111 = arith.constant 0 : index
    %c96_112 = arith.constant 96 : index
    %214 = vector.load %arg9[%c0_111, %c96_112] : memref<1x256xf32, #tpu.memory_space<vmem>>, vector<1x32xf32>
    %215 = arith.addf %213, %214 : vector<1x32xf32>
    %cst_113 = arith.constant 5.000000e-01 : f32
    %216 = vector.broadcast %cst_113 : f32 to vector<1x32xf32>
    %217 = arith.mulf %216, %215 : vector<1x32xf32>
    %cst_114 = arith.constant 4.471500e-02 : f32
    %218 = vector.broadcast %cst_114 : f32 to vector<1x32xf32>
    %219 = arith.mulf %218, %215 : vector<1x32xf32>
    %220 = arith.mulf %219, %215 : vector<1x32xf32>
    %221 = arith.mulf %220, %215 : vector<1x32xf32>
    %222 = arith.addf %215, %221 : vector<1x32xf32>
    %cst_115 = arith.constant 0.797884583 : f32
    %223 = vector.broadcast %cst_115 : f32 to vector<1x32xf32>
    %224 = arith.mulf %223, %222 : vector<1x32xf32>
    %225 = math.tanh %224 : vector<1x32xf32>
    %cst_116 = arith.constant 1.000000e+00 : f32
    %226 = vector.broadcast %cst_116 : f32 to vector<1x32xf32>
    %227 = arith.addf %226, %225 : vector<1x32xf32>
    %228 = arith.mulf %217, %227 : vector<1x32xf32>
    %c0_117 = arith.constant 0 : index
    %c128_118 = arith.constant 128 : index
    %229 = vector.load %arg8[%c0_117, %c128_118] : memref<64x256xf32, #tpu.memory_space<vmem>>, vector<64x32xf32>
    %cst_119 = arith.constant dense<0.000000e+00> : vector<1x32xf32>
    %230 = tpu.matmul %160, %229, %cst_119 {dimension_numbers = #tpu.dot_dimension_numbers<[1], [0], [0], [1], [0, 0, 1, 1], [], []>} : vector<1x64xf32>, vector<64x32xf32>, vector<1x32xf32> -> vector<1x32xf32>
    %c0_120 = arith.constant 0 : index
    %c128_121 = arith.constant 128 : index
    %231 = vector.load %arg9[%c0_120, %c128_121] : memref<1x256xf32, #tpu.memory_space<vmem>>, vector<1x32xf32>
    %232 = arith.addf %230, %231 : vector<1x32xf32>
    %cst_122 = arith.constant 5.000000e-01 : f32
    %233 = vector.broadcast %cst_122 : f32 to vector<1x32xf32>
    %234 = arith.mulf %233, %232 : vector<1x32xf32>
    %cst_123 = arith.constant 4.471500e-02 : f32
    %235 = vector.broadcast %cst_123 : f32 to vector<1x32xf32>
    %236 = arith.mulf %235, %232 : vector<1x32xf32>
    %237 = arith.mulf %236, %232 : vector<1x32xf32>
    %238 = arith.mulf %237, %232 : vector<1x32xf32>
    %239 = arith.addf %232, %238 : vector<1x32xf32>
    %cst_124 = arith.constant 0.797884583 : f32
    %240 = vector.broadcast %cst_124 : f32 to vector<1x32xf32>
    %241 = arith.mulf %240, %239 : vector<1x32xf32>
    %242 = math.tanh %241 : vector<1x32xf32>
    %cst_125 = arith.constant 1.000000e+00 : f32
    %243 = vector.broadcast %cst_125 : f32 to vector<1x32xf32>
    %244 = arith.addf %243, %242 : vector<1x32xf32>
    %245 = arith.mulf %234, %244 : vector<1x32xf32>
    %c0_126 = arith.constant 0 : index
    %c160_127 = arith.constant 160 : index
    %246 = vector.load %arg8[%c0_126, %c160_127] : memref<64x256xf32, #tpu.memory_space<vmem>>, vector<64x32xf32>
    %cst_128 = arith.constant dense<0.000000e+00> : vector<1x32xf32>
    %247 = tpu.matmul %160, %246, %cst_128 {dimension_numbers = #tpu.dot_dimension_numbers<[1], [0], [0], [1], [0, 0, 1, 1], [], []>} : vector<1x64xf32>, vector<64x32xf32>, vector<1x32xf32> -> vector<1x32xf32>
    %c0_129 = arith.constant 0 : index
    %c160_130 = arith.constant 160 : index
    %248 = vector.load %arg9[%c0_129, %c160_130] : memref<1x256xf32, #tpu.memory_space<vmem>>, vector<1x32xf32>
    %249 = arith.addf %247, %248 : vector<1x32xf32>
    %cst_131 = arith.constant 5.000000e-01 : f32
    %250 = vector.broadcast %cst_131 : f32 to vector<1x32xf32>
    %251 = arith.mulf %250, %249 : vector<1x32xf32>
    %cst_132 = arith.constant 4.471500e-02 : f32
    %252 = vector.broadcast %cst_132 : f32 to vector<1x32xf32>
    %253 = arith.mulf %252, %249 : vector<1x32xf32>
    %254 = arith.mulf %253, %249 : vector<1x32xf32>
    %255 = arith.mulf %254, %249 : vector<1x32xf32>
    %256 = arith.addf %249, %255 : vector<1x32xf32>
    %cst_133 = arith.constant 0.797884583 : f32
    %257 = vector.broadcast %cst_133 : f32 to vector<1x32xf32>
    %258 = arith.mulf %257, %256 : vector<1x32xf32>
    %259 = math.tanh %258 : vector<1x32xf32>
    %cst_134 = arith.constant 1.000000e+00 : f32
    %260 = vector.broadcast %cst_134 : f32 to vector<1x32xf32>
    %261 = arith.addf %260, %259 : vector<1x32xf32>
    %262 = arith.mulf %251, %261 : vector<1x32xf32>
    %c0_135 = arith.constant 0 : index
    %c192_136 = arith.constant 192 : index
    %263 = vector.load %arg8[%c0_135, %c192_136] : memref<64x256xf32, #tpu.memory_space<vmem>>, vector<64x32xf32>
    %cst_137 = arith.constant dense<0.000000e+00> : vector<1x32xf32>
    %264 = tpu.matmul %160, %263, %cst_137 {dimension_numbers = #tpu.dot_dimension_numbers<[1], [0], [0], [1], [0, 0, 1, 1], [], []>} : vector<1x64xf32>, vector<64x32xf32>, vector<1x32xf32> -> vector<1x32xf32>
    %c0_138 = arith.constant 0 : index
    %c192_139 = arith.constant 192 : index
    %265 = vector.load %arg9[%c0_138, %c192_139] : memref<1x256xf32, #tpu.memory_space<vmem>>, vector<1x32xf32>
    %266 = arith.addf %264, %265 : vector<1x32xf32>
    %cst_140 = arith.constant 5.000000e-01 : f32
    %267 = vector.broadcast %cst_140 : f32 to vector<1x32xf32>
    %268 = arith.mulf %267, %266 : vector<1x32xf32>
    %cst_141 = arith.constant 4.471500e-02 : f32
    %269 = vector.broadcast %cst_141 : f32 to vector<1x32xf32>
    %270 = arith.mulf %269, %266 : vector<1x32xf32>
    %271 = arith.mulf %270, %266 : vector<1x32xf32>
    %272 = arith.mulf %271, %266 : vector<1x32xf32>
    %273 = arith.addf %266, %272 : vector<1x32xf32>
    %cst_142 = arith.constant 0.797884583 : f32
    %274 = vector.broadcast %cst_142 : f32 to vector<1x32xf32>
    %275 = arith.mulf %274, %273 : vector<1x32xf32>
    %276 = math.tanh %275 : vector<1x32xf32>
    %cst_143 = arith.constant 1.000000e+00 : f32
    %277 = vector.broadcast %cst_143 : f32 to vector<1x32xf32>
    %278 = arith.addf %277, %276 : vector<1x32xf32>
    %279 = arith.mulf %268, %278 : vector<1x32xf32>
    %c0_144 = arith.constant 0 : index
    %c224_145 = arith.constant 224 : index
    %280 = vector.load %arg8[%c0_144, %c224_145] : memref<64x256xf32, #tpu.memory_space<vmem>>, vector<64x32xf32>
    %cst_146 = arith.constant dense<0.000000e+00> : vector<1x32xf32>
    %281 = tpu.matmul %160, %280, %cst_146 {dimension_numbers = #tpu.dot_dimension_numbers<[1], [0], [0], [1], [0, 0, 1, 1], [], []>} : vector<1x64xf32>, vector<64x32xf32>, vector<1x32xf32> -> vector<1x32xf32>
    %c0_147 = arith.constant 0 : index
    %c224_148 = arith.constant 224 : index
    %282 = vector.load %arg9[%c0_147, %c224_148] : memref<1x256xf32, #tpu.memory_space<vmem>>, vector<1x32xf32>
    %283 = arith.addf %281, %282 : vector<1x32xf32>
    %cst_149 = arith.constant 5.000000e-01 : f32
    %284 = vector.broadcast %cst_149 : f32 to vector<1x32xf32>
    %285 = arith.mulf %284, %283 : vector<1x32xf32>
    %cst_150 = arith.constant 4.471500e-02 : f32
    %286 = vector.broadcast %cst_150 : f32 to vector<1x32xf32>
    %287 = arith.mulf %286, %283 : vector<1x32xf32>
    %288 = arith.mulf %287, %283 : vector<1x32xf32>
    %289 = arith.mulf %288, %283 : vector<1x32xf32>
    %290 = arith.addf %283, %289 : vector<1x32xf32>
    %cst_151 = arith.constant 0.797884583 : f32
    %291 = vector.broadcast %cst_151 : f32 to vector<1x32xf32>
    %292 = arith.mulf %291, %290 : vector<1x32xf32>
    %293 = math.tanh %292 : vector<1x32xf32>
    %cst_152 = arith.constant 1.000000e+00 : f32
    %294 = vector.broadcast %cst_152 : f32 to vector<1x32xf32>
    %295 = arith.addf %294, %293 : vector<1x32xf32>
    %296 = arith.mulf %285, %295 : vector<1x32xf32>
    %297 = tpu.concatenate %177, %194, %211, %228, %245, %262, %279, %296 in 0 : vector<1x32xf32>, vector<1x32xf32>, vector<1x32xf32>, vector<1x32xf32>, vector<1x32xf32>, vector<1x32xf32>, vector<1x32xf32>, vector<1x32xf32> -> vector<8x32xf32>
    %298 = arith.addf %297, %114 : vector<8x32xf32>
    %c0_153 = arith.constant 0 : index
    %c0_154 = arith.constant 0 : index
    %299 = vector.load %arg10[%c0_153, %c0_154] : memref<1x32xf32, #tpu.memory_space<vmem>>, vector<1x32xf32>
    %c0_155 = arith.constant 0 : index
    %c0_156 = arith.constant 0 : index
    %300 = vector.load %arg11[%c0_155, %c0_156] : memref<1x32xf32, #tpu.memory_space<vmem>>, vector<1x32xf32>
    %cst_157 = arith.constant dense<0.000000e+00> : vector<8xf32>
    %301 = vector.multi_reduction <add>, %298, %cst_157 [1] : vector<8x32xf32> to vector<8xf32>
    %302 = vector.shape_cast %301 : vector<8xf32> to vector<8x1xf32>
    %cst_158 = arith.constant 3.200000e+01 : f32
    %303 = vector.broadcast %cst_158 : f32 to vector<8x1xf32>
    %304 = arith.divf %302, %303 : vector<8x1xf32>
    %305 = vector.broadcast %304 : vector<8x1xf32> to vector<8x32xf32>
    %306 = arith.subf %298, %305 : vector<8x32xf32>
    %307 = arith.mulf %306, %306 : vector<8x32xf32>
    %cst_159 = arith.constant dense<0.000000e+00> : vector<8xf32>
    %308 = vector.multi_reduction <add>, %307, %cst_159 [1] : vector<8x32xf32> to vector<8xf32>
    %309 = vector.shape_cast %308 : vector<8xf32> to vector<8x1xf32>
    %cst_160 = arith.constant 3.200000e+01 : f32
    %310 = vector.broadcast %cst_160 : f32 to vector<8x1xf32>
    %311 = arith.divf %309, %310 : vector<8x1xf32>
    %312 = vector.broadcast %304 : vector<8x1xf32> to vector<8x32xf32>
    %313 = arith.subf %298, %312 : vector<8x32xf32>
    %cst_161 = arith.constant 9.99999974E-6 : f32
    %314 = vector.broadcast %cst_161 : f32 to vector<8x1xf32>
    %315 = arith.addf %311, %314 : vector<8x1xf32>
    %316 = math.rsqrt %315 : vector<8x1xf32>
    %317 = vector.broadcast %316 : vector<8x1xf32> to vector<8x32xf32>
    %318 = arith.mulf %313, %317 : vector<8x32xf32>
    %319 = vector.broadcast %299 : vector<1x32xf32> to vector<8x32xf32>
    %320 = arith.mulf %318, %319 : vector<8x32xf32>
    %321 = vector.broadcast %300 : vector<1x32xf32> to vector<8x32xf32>
    %322 = arith.addf %320, %321 : vector<8x32xf32>
    %c0_162 = arith.constant 0 : index
    %c0_163 = arith.constant 0 : index
    %c0_164 = arith.constant 0 : index
    %323 = vector.load %arg12[%c0_162, %c0_163, %c0_164] : memref<1x8x32xf32, #tpu.memory_space<vmem>>, vector<1x8x32xf32>
    %324 = vector.shape_cast %323 : vector<1x8x32xf32> to vector<8x32xf32>
    %325 = vector.shape_cast %322 : vector<8x32xf32> to vector<1x8x32xf32>
    tpu.vector_store %arg12[%c0_162, %c0_163, %c0_164], %325 {strides = array<i32>} : memref<1x8x32xf32, #tpu.memory_space<vmem>>, vector<1x8x32xf32>,
    return
  }
  func.func @transform_0(%arg0: i32) -> (i32, i32, i32) {
    %c0_i32 = arith.constant 0 : i32
    %c0_i32_0 = arith.constant 0 : i32
    %c0_i32_1 = arith.constant 0 : i32
    return %arg0, %c0_i32, %c0_i32_0 : i32, i32, i32
  }
  func.func @transform_1(%arg0: i32) -> (i32, i32) {
    %c0_i32 = arith.constant 0 : i32
    %c0_i32_0 = arith.constant 0 : i32
    %c0_i32_1 = arith.constant 0 : i32
    return %c0_i32, %c0_i32_0 : i32, i32
  }
  func.func @transform_2(%arg0: i32) -> (i32, i32) {
    %c0_i32 = arith.constant 0 : i32
    %c0_i32_0 = arith.constant 0 : i32
    %c0_i32_1 = arith.constant 0 : i32
    return %c0_i32, %c0_i32_0 : i32, i32
  }
  func.func @transform_3(%arg0: i32) -> (i32, i32) {
    %c0_i32 = arith.constant 0 : i32
    %c0_i32_0 = arith.constant 0 : i32
    %c0_i32_1 = arith.constant 0 : i32
    return %c0_i32, %c0_i32_0 : i32, i32
  }
  func.func @transform_4(%arg0: i32) -> (i32, i32) {
    %c0_i32 = arith.constant 0 : i32
    %c0_i32_0 = arith.constant 0 : i32
    %c0_i32_1 = arith.constant 0 : i32
    return %c0_i32, %c0_i32_0 : i32, i32
  }
  func.func @transform_5(%arg0: i32) -> (i32, i32) {
    %c0_i32 = arith.constant 0 : i32
    %c0_i32_0 = arith.constant 0 : i32
    %c0_i32_1 = arith.constant 0 : i32
    return %c0_i32, %c0_i32_0 : i32, i32
  }
  func.func @transform_6(%arg0: i32) -> (i32, i32) {
    %c0_i32 = arith.constant 0 : i32
    %c0_i32_0 = arith.constant 0 : i32
    %c0_i32_1 = arith.constant 0 : i32
    return %c0_i32, %c0_i32_0 : i32, i32
  }
  func.func @transform_7(%arg0: i32) -> (i32, i32) {
    %c0_i32 = arith.constant 0 : i32
    %c0_i32_0 = arith.constant 0 : i32
    %c0_i32_1 = arith.constant 0 : i32
    return %c0_i32, %c0_i32_0 : i32, i32
  }
  func.func @transform_8(%arg0: i32) -> (i32, i32) {
    %c0_i32 = arith.constant 0 : i32
    %c0_i32_0 = arith.constant 0 : i32
    %c0_i32_1 = arith.constant 0 : i32
    return %c0_i32, %c0_i32_0 : i32, i32
  }
  func.func @transform_9(%arg0: i32) -> (i32, i32) {
    %c0_i32 = arith.constant 0 : i32
    %c0_i32_0 = arith.constant 0 : i32
    %c0_i32_1 = arith.constant 0 : i32
    return %c0_i32, %c0_i32_0 : i32, i32
  }
  func.func @transform_10(%arg0: i32) -> (i32, i32) {
    %c0_i32 = arith.constant 0 : i32
    %c0_i32_0 = arith.constant 0 : i32
    %c0_i32_1 = arith.constant 0 : i32
    return %c0_i32, %c0_i32_0 : i32, i32
  }
  func.func @transform_11(%arg0: i32) -> (i32, i32, i32) {
    %c0_i32 = arith.constant 0 : i32
    %c0_i32_0 = arith.constant 0 : i32
    %c0_i32_1 = arith.constant 0 : i32
    return %arg0, %c0_i32, %c0_i32_0 : i32, i32, i32
  }
}

</mosaic_0001>

<bundles_post_ra>
// kernel: tpu_custom_call.1
= control target key start
LH: loop header
LB: loop body
LE: loop exit
PB: predicated region body
PF: predicated region fallthrough
CT: control target
= control target key end

     0   :  { %s4725_s0 = inlined_call_operand.vmem [shape: f32[2,8,32], index: 0, kind: input, shape index: {}]   ;;  %s4726_s1 = inlined_call_operand.vmem [shape: f32[32,192], index: 1, kind: input, shape index: {}]   ;;  %s4727_s2 = inlined_call_operand.vmem [shape: f32[64,32], index: 2, kind: input, shape index: {}]   ;;  %s4728_s3 = inlined_call_operand.vmem [shape: f32[1,32], index: 3, kind: input, shape index: {}]   ;;  %s4729_s4 = inlined_call_operand.vmem [shape: f32[1,32], index: 4, kind: input, shape index: {}]   ;;  %s4730_s5 = inlined_call_operand.vmem [shape: f32[256,64], index: 5, kind: input, shape index: {}]   ;;  %s4731_s6 = inlined_call_operand.vmem [shape: f32[1,64], index: 6, kind: input, shape index: {}]   ;;  %s4732_s7 = inlined_call_operand.vmem [shape: f32[64,256], index: 7, kind: input, shape index: {}]   ;;  %s4733_s8 = inlined_call_operand.vmem [shape: f32[1,256], index: 8, kind: input, shape index: {}]   ;;  %s4734_s9 = inlined_call_operand.vmem [shape: f32[1,32], index: 9, kind: input, shape index: {}]   ;;  %s4735_s10 = inlined_call_operand.vmem [shape: f32[1,32], index: 10, kind: input, shape index: {}]   ;;  %s4736_s11 = inlined_call_operand.hbm [shape: f32[2,8,32], index: 11, kind: output, shape index: {}]  }
   0x1   :  { %4743 = sst [smem:[#allocation6_spill]] %s4725_s0 }
   0x2   :  { %4744 = sst [smem:[#allocation7_spill]] %s4726_s1 }
   0x3   :  { %16 = vsyncpa [#allocation4], 0 }
   0x4   :  { %18 = vsyncpa [#allocation4 + $0x1], 0  ;;  %s4068_s17 = smov 0   ;;  %s4070_s18 = smov 0  }
   0x5   :  { %s4072_s19 = smov 0   ;;  %s4074_s20 = smov 0  }
   0x6 LB: > { %s4089_s21 = sadd.s32 4294967295, %s3990_s20   ;;  %s3042_s22 = sadd.s32 4294967294, %s3990_s20   ;;  %s3990_s20 = sphi %s4074_s20, %s4755_s20   ;;  %s3986_s19 = sphi %s4072_s19, %s4754_s19   ;;  %s3982_s18 = sphi %s4070_s18, %s4753_s18   ;;  %s3978_s17 = sphi %s4068_s17, %s4752_s17  }
   0x7   : > { %s4093_s23 = sadd.s32 1, %s3990_s20   ;;  %s267_s24 = sadd.s32 1, %s3986_s19 }
   0x8   : > { %s264_s25 = ssub.s32 %s3990_s20, %s4093_s23  ;;  %p277_p0 = scmp.ne.s32.totalorder %s3986_s19, %s3982_s18 }
   0x9   : > { %p265_p1 = scmp.eq.s32.totalorder %s264_s25, 0  ;;  %p278_p2 = scmp.eq.s32.totalorder %s4089_s21, 1 }
   0xa   : > { %p283_p3 = scmp.ne.s32.totalorder %s3982_s18, %s3978_s17  ;;  %p284_p4 = scmp.eq.s32.totalorder %s3042_s22, 1 }
   0xb   : > { %s4104_s26 = scalar_select %p265_p1, %s3986_s19, %s267_s24  }
   0xc   : > { %p4106_p5 = por %p278_p2, %p277_p0  ;;  %p4110_p6 = por %p284_p4, %p283_p3 }
   0xd   : > { %p3045_p7 = scmp.ge.s32.totalorder %s3990_s20, 1  ;;  %p339_p8 = scmp.lt.s32.totalorder %s3990_s20, 3 }
   0xf   : > { %p340_p9 = pnand %p3045_p7, %p339_p8 }
  0x10   : > { %s4747_s1 = sld [smem:[#allocation7_spill]] (!%p340_p9)  ;;  %p378_p10 = scmp.lt.s32.totalorder (!%p340_p9), %s4089_s21, 1  ;;  %v3992_v7 = vmov (!%p340_p9), 0.0   ;;  %vm391_vm0 = vcmask (!%p340_p9), 261120   ;;  %vm3993_vm1 = vmmov (!%p340_p9), 0   ;;  %vm467_vm2 = vcmask (!%p340_p9), 523264  }
  0x11   : > { %343 = sbr.rel (%p340_p9) target bundleno = 2752 (0xac0), region = 64  ;;  %459 = vmatprep.mubr.f32.mxu0 (!%p340_p9), %v3992_v7  ;;  %3230 = vmatprep.subr.mxu1 (!%p340_p9), %v3992_v7  ;;  %s4748_s0 = sld [smem:[#allocation6_spill]] (!%p340_p9)  ;;  %vm476_vm3 = vcmask (!%p340_p9), 64512   ;;  %vm1309_vm4 = vcmask (!%p340_p9), 1040384   ;;  %vm1311_vm5 = vcmask (!%p340_p9), 1041408   ;;  %vm1313_vm6 = vcmask (!%p340_p9), 1042432  }
  0x12   : > { %3232 = vmatprep.mubr.msk.f32.mxu1 (!%p340_p9), %vm3993_vm1, %v3992_v7  ;;  %s3994_s30 = smov (!%p340_p9), 112   ;;  %s4739_s12 = smov (!%p340_p9), 96   ;;  %vm1315_vm7 = vcmask (!%p340_p9), 1043456   ;;  %vm1317_vm8 = vcmask (!%p340_p9), 1044480   ;;  %vm1319_vm9 = vcmask (!%p340_p9), 1045504   ;;  %vm1321_vm10 = vcmask (!%p340_p9), 1046528  }
  0x13   : > { %s3996_s13 = smov (!%p340_p9), 88   ;;  %s3997_s14 = smov (!%p340_p9), 80  }
  0x14   : > { %s3998_s15 = smov (!%p340_p9), 120   ;;  %s4001_s24 = smov (!%p340_p9), 104  }
  0x15   : > { %s4002_s25 = smov (!%p340_p9), 24  }
  0x16   : > { %v384_v0 = vld [vmem:[%s4747_s1 + $0x8] sm:$0xff] (!%p340_p9)  ;;  %v386_v1 = vld [vmem:[%s4747_s1 + $0x18] sm:$0xff] (!%p340_p9)  ;;  %v383_v2 = vld [vmem:[%s4747_s1] sm:$0xff] (!%p340_p9) }
  0x17   : > { %v3534_v3 = vpack.c.bf16 (!%p340_p9), %v386_v1, %v384_v0  ;;  %v385_v4 = vld [vmem:[%s4747_s1 + $0x10] sm:$0xff] (!%p340_p9)  ;;  %v388_v5 = vld [vmem:[%s4747_s1 + $0x28] sm:$0xff] (!%p340_p9)  ;;  %v390_v6 = vld [vmem:[%s4747_s1 + $0x38] sm:$0xff] (!%p340_p9) }
  0x18   : > { %v3536_v8 = vpack.c.bf16 %v385_v4, %v383_v2  ;;  %v3538_v9 = vpack.c.bf16 %v390_v6, %v388_v5  ;;  %v387_v10 = vld [vmem:[%s4747_s1 + $0x20] sm:$0xff]  ;;  %v389_v11 = vld [vmem:[%s4747_s1 + $0x30] sm:$0xff]  ;;  %s379_s16 = scalar_select %p378_p10, %s4089_s21, 1 }
  0x19   : > { %3535 = vmatprep.subr.bf16.mxu0 %v3534_v3  ;;  %v3540_v12 = vpack.c.bf16 %v389_v11, %v387_v10 }
  0x1a   : > { %3537 = vmatpush1.bf16.msra.mxu0 %v3536_v8  ;;  %s3047_s22 = sshll.u32 %s379_s16, 3  ;;  %s3999_s16 = smov 72  }
  0x1b   : > { %3539 = vmatprep.subr.bf16.mxu0 %v3538_v9  ;;  %s381_s29 = scalar_lea.vmem %s4748_s0, %s3047_s22  ;;  %s4737_s22 = smov 64  }
  0x1c   : > { %v4147_v13 = vld [vmem:[%s381_s29] sm:$0xff]  ;;  %s4741_s29 = smov 32  }
  0x1e   : > { %3541 = vmatpush1.bf16.msra.mxu0 %v3540_v12 }
  0x1f   : > { %3225 = vmatprep.subr.mxu0 %v3992_v7 }
  0x21   : > { %3048 = vmatmul.mubr.msk.f32.vlgmr.msra.gmra.mrb[0].mxu0 %vm391_vm0, %v4147_v13 }
  0x22   : > { %3227 = vmatprep.mubr.msk.f32.mxu0 %vm3993_vm1, %v3992_v7 }
  0xf4   : > { %v461_v14 = vpop.f32.mrb[0].mxu0 }
  0xf5   : > { %v463_v15 = vpop.f32.mrb[1].mxu0  ;;  %624 = vrot.lane.b32.xlu1 %v461_v14, %s3994_s30  ;;  %549 = vrot.lane.b32.xlu0 %v461_v14, %s4739_s12 }
  0xf6   : > { %468 = vst.msk [vmem:[#allocation2 + $0x8] sm:$0xff] %vm467_vm2, %v463_v15 }
  0xf9   : > { %473 = vrot.lane.b32.xlu1 %v461_v14, %s3996_s13  ;;  %626 = vrot.lane.b32.xlu0 %v461_v14, %s3997_s14  ;;  %s4004_s13 = smov 16   ;;  %s4005_s14 = smov 8  }
  0xfd   : > { %471 = vrot.lane.b32.xlu1 %v461_v14, %s3998_s15  ;;  %704 = vrot.lane.b32.xlu0 %v461_v14, %s3999_s16  ;;  %v4159_v16 = vld [vmem:[#allocation2 + $0x8] sm:$0xff] }
 0x101   : > { %800 = vrot.lane.b32.xlu1 %v461_v14, %s4737_s22  ;;  %702 = vrot.lane.b32.xlu0 %v461_v14, %s4001_s24 }
 0x105   : > { %877 = vrot.lane.b32.xlu1 %v461_v14, %s4002_s25  ;;  %880 = vrot.lane.b32.xlu0 %v4159_v16, %s3998_s15  ;;  %s4750_s25 = smov 96  }
 0x109   : > { %1031 = vrot.lane.b32.xlu1 %v4159_v16, %s3994_s30  ;;  %955 = vrot.lane.b32.xlu0 %v461_v14, %s4741_s29  ;;  %s4749_s30 = smov 64  }
 0x10d   : > { %1109 = vrot.lane.b32.xlu1 %v4159_v16, %s4001_s24  ;;  %1029 = vrot.lane.b32.xlu0 %v461_v14, %s4004_s13  ;;  %s4751_s13 = smov 32   ;;  %s3081_s24 = sshll.u32 %s4089_s21, 7 }
 0x10e   : > { %s4682_s0 = scalar_lea.hbm %s4736_s11, %s3081_s24  ;;  %s4007_s21 = smov [#allocation3]  }
 0x111   : > { %1205 = vrot.lane.b32.xlu1 %v4159_v16, %s4739_s12  ;;  %1107 = vrot.lane.b32.xlu0 %v461_v14, %s4005_s14 }
 0x167   : > { %v625_v17 = vpop.permute.xlu1 %624  ;;  %v550_v18 = vpop.permute.xlu0 %549 }
 0x168   : > { %3231 = vmatpush3.msra.mxu1 %v550_v18 }
 0x169   : > { %3233 = vmatmul.mubr.msk.f32.vlgmr.msra.gmra.mrb[0].mxu1 %vm476_vm3, %v461_v14  ;;  %3235 = vmatprep.subr.mxu1 %v3992_v7 }
 0x16a   : > { %3237 = vmatprep.mubr.msk.f32.mxu1 %vm3993_vm1, %v3992_v7 }
 0x16b   : > { %v474_v19 = vpop.permute.xlu1 %473  ;;  %v627_v20 = vpop.permute.xlu0 %626 }
 0x16c   : > { %3226 = vmatpush3.msra.mxu0 %v474_v19  ;;  %3236 = vmatpush3.msra.mxu1 %v627_v20 }
 0x16d   : > { %3240 = vmatprep.subr.mxu1 %v3992_v7  ;;  %3245 = vmatprep.subr.mxu0 %v3992_v7 }
 0x16f   : > { %v472_v21 = vpop.permute.xlu1 %471  ;;  %v705_v22 = vpop.permute.xlu0 %704 }
 0x170   : > { %3228 = vmatmul.mubr.msk.f32.vlgmr.msra.gmra.mrb[2].mxu0 %vm476_vm3, %v472_v21  ;;  %v1323_v21 = vld [vmem:[%s4727_s2] sm:$0xff] }
 0x171   : > { %3238 = vmatmul.mubr.msk.f32.vlgmr.msra.gmra.mrb[0].mxu1 %vm476_vm3, %v625_v17  ;;  %3247 = vmatprep.mubr.msk.f32.mxu0 %vm3993_vm1, %v3992_v7 }
 0x172   : > { %3241 = vmatpush3.msra.mxu1 %v705_v22  ;;  %3242 = vmatprep.mubr.msk.f32.mxu1 %vm3993_vm1, %v3992_v7  ;;  %v1324_v22 = vld [vmem:[%s4727_s2 + $0x8] sm:$0xff] }
 0x173   : > { %v801_v23 = vpop.permute.xlu1 %800  ;;  %3270 = vmatprep.subr.mxu1 %v3992_v7  ;;  %v703_v25 = vpop.permute.xlu0 %702 }
 0x174   : > { %3246 = vmatpush3.msra.mxu0 %v801_v23  ;;  %v1325_v23 = vld [vmem:[%s4727_s2 + $0x10] sm:$0xff] }
 0x175   : > { %3250 = vmatprep.subr.mxu0 %v3992_v7 }
 0x177   : > { %v878_v24 = vpop.permute.xlu1 %877  ;;  %v881_v54 = vpop.permute.xlu0 %880 }
 0x179   : > { %3243 = vmatmul.mubr.msk.f32.vlgmr.msra.gmra.mrb[0].mxu1 %vm476_vm3, %v703_v25  ;;  %v3543_v25 = vpack.c.bf16 %v1324_v22, %v1323_v21  ;;  %v4349_v22 = vld [vmem:[%s4732_s7 + $0x48] sm:$0xff] }
 0x17a   : > { %3272 = vmatprep.mubr.msk.f32.mxu1 %vm3993_vm1, %v3992_v7 }
 0x17b   : > { %v1032_v26 = vpop.permute.xlu1 %1031  ;;  %v956_v55 = vpop.permute.xlu0 %955 }
 0x17f   : > { %v1110_v27 = vpop.permute.xlu1 %1109  ;;  %v1030_v56 = vpop.permute.xlu0 %1029 }
 0x183   : > { %v1206_v28 = vpop.permute.xlu1 %1205  ;;  %v1108_v57 = vpop.permute.xlu0 %1107 }
 0x184   : > { %3271 = vmatpush3.msra.mxu1 %v1206_v28  ;;  %v1327_v28 = vld [vmem:[%s4727_s2 + $0x20] sm:$0xff] }
 0x243   : > { %v545_v29 = vpop.f32.mrb[2].mxu0 }
 0x244   : > { %v3229_v30 = vpop.f32.mrb[3].mxu0 }
 0x24c   : > { %v775_v31 = vpop.f32.mrb[0].mxu1 }
 0x24d   : > { %v3698_v32 = vadd.f32 %v775_v31, %v545_v29  ;;  %v3244_v33 = vpop.f32.mrb[1].mxu1  ;;  %v1328_v29 = vld [vmem:[%s4727_s2 + $0x28] sm:$0xff]  ;;  %v1329_v31 = vld [vmem:[%s4727_s2 + $0x30] sm:$0xff] }
 0x24e   : > { %v3549_v30 = vpack.c.bf16 %v1328_v29, %v1327_v28  ;;  %v4375_v29 = vld [vmem:[%s4732_s7 + $0x68] sm:$0xff] }
 0x24f   : > { %v780_v34 = vmul.f32 0.35355338, %v3698_v32  ;;  %v1330_v32 = vld [vmem:[%s4727_s2 + $0x38] sm:$0xff] }
 0x250   : > { %v3552_v33 = vpack.c.bf16 %v1330_v32, %v1329_v31 }
 0x251   : > { %v781_v35 = vsel %vm476_vm3, %v780_v34, -inf }
 0x252   : > { %v782_v36 = vrot.slane %v781_v35, 4 }
 0x254   : > { %v783_v37 = vmax.f32 %v781_v35, %v782_v36 }
 0x256   : > { %v784_v38 = vrot.slane %v783_v37, 2 }
 0x258   : > { %v785_v39 = vmax.f32 %v783_v37, %v784_v38 }
 0x25a   : > { %v786_v40 = vrot.slane %v785_v39, 1 }
 0x25c   : > { %v787_v41 = vmax.f32 %v785_v39, %v786_v40 }
 0x25e   : > { %v788_v42 = vsub.f32 %v780_v34, %v787_v41 }
 0x260   : > { %v789_v43 = vmul.f32 1.442695, %v788_v42 }
 0x262   : > { %3898 = vpow2.f32 %v789_v43 }
 0x26c   : > { %v3899_v44 = vpop.eup %3898 }
 0x26d   : > { %v791_v45 = vsel %vm476_vm3, %v3899_v44, 0.0 }
 0x26e   : > { %v792_v46 = vrot.slane %v791_v45, 4 }
 0x270   : > { %v793_v47 = vadd.f32 %v792_v46, %v791_v45 }
 0x272   : > { %v794_v48 = vrot.slane %v793_v47, 2 }
 0x274   : > { %v795_v49 = vadd.f32 %v794_v48, %v793_v47 }
 0x276   : > { %v796_v50 = vrot.slane %v795_v49, 1 }
 0x278   : > { %v797_v51 = vadd.f32 %v796_v50, %v795_v49 }
 0x27a   : > { %3900 = vrcp.f32 %v797_v51 }
 0x284   : > { %v3901_v52 = vpop.eup %3900 }
 0x285   : > { %v799_v53 = vmul.f32 %v3901_v52, %v3899_v44 }
 0x287   : > { %3248 = vmatmul.mubr.msk.f32.vlgmr.msra.gmra.mrb[4].mxu0 %vm476_vm3, %v799_v53 }
 0x288   : > { %3251 = vmatpush3.msra.mxu0 %v881_v54  ;;  %3252 = vmatprep.mubr.msk.f32.mxu0 %vm3993_vm1, %v3992_v7 }
 0x289   : > { %3255 = vmatprep.subr.mxu0 %v3992_v7 }
 0x28b   : > { %3253 = vmatmul.mubr.msk.f32.vlgmr.msra.gmra.mrb[6].mxu0 %vm476_vm3, %v878_v24  ;;  %v4006_v24 = vmov 0.0|0.0  }
 0x28c   : > { %3256 = vmatpush3.msra.mxu0 %v4159_v16  ;;  %3257 = vmatprep.mubr.msk.f32.mxu0 %vm3993_vm1, %v3992_v7 }
 0x28d   : > { %3260 = vmatprep.subr.mxu0 %v3992_v7  ;;  %3542 = vmatprep.subr.bf16.mxu1 %v4006_v24 }
 0x293   : > { %3258 = vmatmul.mubr.msk.f32.vlgmr.msra.gmra.mrb[6].mxu0 %vm476_vm3, %v956_v55 }
 0x294   : > { %3261 = vmatpush3.msra.mxu0 %v1032_v26  ;;  %3262 = vmatprep.mubr.msk.f32.mxu0 %vm3993_vm1, %v3992_v7  ;;  %v1326_v26 = vld [vmem:[%s4727_s2 + $0x18] sm:$0xff] }
 0x295   : > { %3265 = vmatprep.subr.mxu0 %v3992_v7 }
 0x29b   : > { %3263 = vmatmul.mubr.msk.f32.vlgmr.msra.gmra.mrb[6].mxu0 %vm476_vm3, %v1030_v56 }
 0x29c   : > { %3266 = vmatpush3.msra.mxu0 %v1110_v27  ;;  %3267 = vmatprep.mubr.msk.f32.mxu0 %vm3993_vm1, %v3992_v7  ;;  %v3546_v27 = vpack.c.bf16 %v1326_v26, %v1325_v23  ;;  %v4354_v23 = vld [vmem:[%s4732_s7 + $0x58] sm:$0xff] }
 0x29d   : > { %3554 = vmatprep.subr.bf16.mxu0 %v4006_v24  ;;  %v4364_v26 = vld [vmem:[%s4732_s7 + $0x38] sm:$0xff]  ;;  %v3848_v28 = vpack.i.bf16 %v4354_v23, %v4349_v22 }
 0x2a3   : > { %3268 = vmatmul.mubr.msk.f32.vlgmr.msra.gmra.mrb[6].mxu0 %vm476_vm3, %v1108_v57 }
 0x2a4   : > { %3302 = vmatprep.mubr.msk.f32.mxu0 %vm3993_vm1, %v3992_v7 }
 0x35a   : > { %v872_v58 = vpop.f32.mrb[4].mxu0 }
 0x35b   : > { %v1282_v59 = vrot.slane %v872_v58, 1  ;;  %v3249_v60 = vpop.f32.mrb[5].mxu0 }
 0x35d   : > { %1283 = vrot.lane.b32.xlu0 %v1282_v59, %s4741_s29 }
 0x376   : > { %v1180_v61 = vpop.f32.mrb[6].mxu0 }
 0x377   : > { %v1185_v62 = vmul.f32 0.35355338, %v1180_v61  ;;  %v3269_v63 = vpop.f32.mrb[7].mxu0 }
 0x379   : > { %v1186_v0 = vsel %vm476_vm3, %v1185_v62, -inf }
 0x37a   : > { %v1187_v1 = vrot.slane %v1186_v0, 4 }
 0x37c   : > { %v1188_v2 = vmax.f32 %v1186_v0, %v1187_v1  ;;  %v1436_v0 = vld [vmem:[%s4730_s5] sm:$0xff] }
 0x37e   : > { %v1189_v3 = vrot.slane %v1188_v2, 2 }
 0x380   : > { %v1190_v4 = vmax.f32 %v1188_v2, %v1189_v3  ;;  %v1438_v2 = vld [vmem:[%s4730_s5 + $0x10] sm:$0xff]  ;;  %v1439_v3 = vld [vmem:[%s4730_s5 + $0x18] sm:$0xff] }
 0x382   : > { %v1191_v5 = vrot.slane %v1190_v4, 1 }
 0x384   : > { %v1192_v6 = vmax.f32 %v1190_v4, %v1191_v5  ;;  %v3558_v4 = vpack.c.bf16 %v1439_v3, %v1438_v2  ;;  %v4278_v5 = vld [vmem:[%s4732_s7] sm:$0xff] }
 0x385   : > { %v1826_v3 = vld [vmem:[%s4730_s5 + $0xa0] sm:$0xff] }
 0x386   : > { %v1193_v8 = vsub.f32 %v1185_v62, %v1192_v6  ;;  %v4283_v6 = vld [vmem:[%s4732_s7 + $0x10] sm:$0xff] }
 0x388   : > { %v1194_v9 = vmul.f32 1.442695, %v1193_v8  ;;  %v4288_v8 = vld [vmem:[%s4732_s7 + $0x40] sm:$0xff] }
 0x38a   : > { %3902 = vpow2.f32 %v1194_v9  ;;  %v3778_v9 = vpack.i.bf16 %v4283_v6, %v4278_v5 }
 0x394   : > { %v3903_v10 = vpop.eup %3902 }
 0x395   : > { %v1196_v11 = vsel %vm476_vm3, %v3903_v10, 0.0 }
 0x396   : > { %v1197_v12 = vrot.slane %v1196_v11, 4 }
 0x398   : > { %v1198_v14 = vadd.f32 %v1197_v12, %v1196_v11  ;;  %v4303_v12 = vld [vmem:[%s4732_s7 + $0x20] sm:$0xff] }
 0x39a   : > { %v1199_v15 = vrot.slane %v1198_v14, 2 }
 0x39c   : > { %v1200_v16 = vadd.f32 %v1199_v15, %v1198_v14  ;;  %v4308_v14 = vld [vmem:[%s4732_s7 + $0x30] sm:$0xff] }
 0x39d   : > { %v3783_v15 = vpack.i.bf16 %v4308_v14, %v4303_v12 }
 0x39e   : > { %v1201_v17 = vrot.slane %v1200_v16, 1 }
 0x3a0   : > { %v1202_v18 = vadd.f32 %v1201_v17, %v1200_v16  ;;  %v4315_v16 = vld [vmem:[%s4732_s7 + $0x60] sm:$0xff]  ;;  %v4320_v17 = vld [vmem:[%s4732_s7 + $0x70] sm:$0xff] }
 0x3a2   : > { %3904 = vrcp.f32 %v1202_v18  ;;  %v3793_v18 = vpack.i.bf16 %v4320_v17, %v4315_v16 }
 0x3ac   : > { %v3905_v19 = vpop.eup %3904 }
 0x3ad   : > { %v1204_v20 = vmul.f32 %v3905_v19, %v3903_v10  ;;  %v4295_v10 = vld [vmem:[%s4732_s7 + $0x50] sm:$0xff]  ;;  %v4335_v19 = vld [vmem:[%s4732_s7 + $0x8] sm:$0xff] }
 0x3ae   : > { %v3788_v11 = vpack.i.bf16 %v4295_v10, %v4288_v8 }
 0x3af   : > { %3273 = vmatmul.mubr.msk.f32.vlgmr.msra.gmra.mrb[2].mxu1 %vm476_vm3, %v1204_v20  ;;  %v4340_v20 = vld [vmem:[%s4732_s7 + $0x18] sm:$0xff] }
 0x3b0   : > { %3291 = vmatprep.mubr.msk.f32.mxu1 %vm3993_vm1, %v3992_v7  ;;  %3544 = vmatpush3.bf16.msra.mxu1 %v3543_v25  ;;  %v3838_v21 = vpack.i.bf16 %v4340_v20, %v4335_v19  ;;  %v4359_v25 = vld [vmem:[%s4732_s7 + $0x28] sm:$0xff] }
 0x3b1   : > { %3545 = vmatprep.subr.bf16.mxu1 %v4006_v24 }
 0x3b4   : > { %3547 = vmatpush3.bf16.msra.mxu1 %v3546_v27  ;;  %v3843_v27 = vpack.i.bf16 %v4364_v26, %v4359_v25 }
 0x3b5   : > { %3548 = vmatprep.subr.bf16.mxu1 %v4006_v24 }
 0x3b8   : > { %3550 = vmatpush3.bf16.msra.mxu1 %v3549_v30  ;;  %v4380_v30 = vld [vmem:[%s4732_s7 + $0x78] sm:$0xff] }
 0x3b9   : > { %3551 = vmatprep.subr.bf16.mxu1 %v4006_v24  ;;  %v3853_v31 = vpack.i.bf16 %v4380_v30, %v4375_v29 }
 0x3bc   : > { %3553 = vmatpush3.bf16.msra.mxu1 %v3552_v33 }
 0x3bd   : > { %3602 = vmatprep.subr.bf16.mxu1 %v4006_v24 }
 0x3cf   : > { %v1284_v37 = vpop.permute.xlu0 %1283 }
 0x3d0   : > { %v1286_v38 = vsel %vm391_vm0, %v872_v58, %v1284_v37 }
 0x3d1   : > { %v1294_v39 = vrot.slane %v1286_v38, 1  ;;  %v1296_v40 = vrot.slane %v1286_v38, 2  ;;  %v1298_v44 = vrot.slane %v1286_v38, 3 }
 0x3d3   : > { %v1310_v41 = vsel %vm1309_vm4, %v1286_v38, %v1294_v39  ;;  %v1514_v38 = vld [vmem:[%s4730_s5 + $0x20] sm:$0xff]  ;;  %v1515_v39 = vld [vmem:[%s4730_s5 + $0x28] sm:$0xff] }
 0x3d4   : > { %v1312_v42 = vsel %vm1311_vm5, %v1310_v41, %v1296_v40  ;;  %v3061_v40 = vld [vmem:[%s4729_s4] ss:$0 sm:$0xff] }
 0x3d5   : > { %v1314_v48 = vsel %vm1313_vm6, %v1312_v42, %v1298_v44  ;;  %v3561_v42 = vpack.c.bf16 %v1515_v39, %v1514_v38  ;;  %v1516_v44 = vld [vmem:[%s4730_s5 + $0x30] sm:$0xff] }
 0x482   : > { %v1277_v34 = vpop.f32.mrb[2].mxu1 }
 0x483   : > { %v1288_v35 = vrot.slane %v1277_v34, 1  ;;  %v3274_v36 = vpop.f32.mrb[3].mxu1 }
 0x484   : > { %v3060_v36 = vld [vmem:[%s4728_s3] ss:$0 sm:$0xff] }
 0x485   : > { %1289 = vrot.lane.b32.xlu1 %v1288_v35, %s4741_s29 }
 0x4f7   : > { %v1290_v43 = vpop.permute.xlu1 %1289 }
 0x4f8   : > { %v1292_v45 = vsel %vm391_vm0, %v1277_v34, %v1290_v43 }
 0x4f9   : > { %v1301_v46 = vrot.slane %v1292_v45, 4  ;;  %v1303_v47 = vrot.slane %v1292_v45, 5  ;;  %v1305_v49 = vrot.slane %v1292_v45, 6  ;;  %v1307_v51 = vrot.slane %v1292_v45, 7  ;;  %v1517_v45 = vld [vmem:[%s4730_s5 + $0x38] sm:$0xff] }
 0x4fb   : > { %v1316_v50 = vsel %vm1315_vm7, %v1314_v48, %v1301_v46  ;;  %v3564_v46 = vpack.c.bf16 %v1517_v45, %v1516_v44  ;;  %v1593_v48 = vld [vmem:[%s4730_s5 + $0x48] sm:$0xff]  ;;  %v3603_v45 = vpack.c.bf16 %v4283_v6, %v4278_v5  ;;  %v3609_v5 = vpack.c.bf16 %v4295_v10, %v4288_v8 }
 0x4fc   : > { %v1318_v52 = vsel %vm1317_vm8, %v1316_v50, %v1303_v47  ;;  %v1592_v47 = vld [vmem:[%s4730_s5 + $0x40] sm:$0xff]  ;;  %v3657_v6 = vpack.c.bf16 %v4354_v23, %v4349_v22 }
 0x4fd   : > { %v1320_v53 = vsel %vm1319_vm9, %v1318_v52, %v1305_v49  ;;  %v3567_v49 = vpack.c.bf16 %v1593_v48, %v1592_v47  ;;  %v1595_v52 = vld [vmem:[%s4730_s5 + $0x58] sm:$0xff]  ;;  %v3606_v47 = vpack.c.bf16 %v4308_v14, %v4303_v12  ;;  %v3654_v48 = vpack.c.bf16 %v4364_v26, %v4359_v25  ;;  %v4573_v26 = vld [vmem:[%s4733_s8 + $0x1] sm:$0x1] }
 0x4fe   : > { %v1322_v54 = vsel %vm1321_vm10, %v1320_v53, %v1307_v51  ;;  %v1594_v51 = vld [vmem:[%s4730_s5 + $0x50] sm:$0xff]  ;;  %v3612_v12 = vpack.c.bf16 %v4320_v17, %v4315_v16  ;;  %v3660_v14 = vpack.c.bf16 %v4380_v30, %v4375_v29  ;;  %v4567_v16 = vld [vmem:[%s4733_s8] sm:$0x1] }
 0x4ff   : > { %3292 = vmatmul.mubr.msk.f32.vlgmr.msra.gmra.mrb[4].mxu1 %vm467_vm2, %v1322_v54  ;;  %v3570_v53 = vpack.c.bf16 %v1595_v52, %v1594_v51  ;;  %v1670_v54 = vld [vmem:[%s4730_s5 + $0x60] sm:$0xff] }
 0x500   : > { %3398 = vmatprep.mubr.msk.f32.mxu1 %vm3993_vm1, %v3992_v7  ;;  %3604 = vmatpush3.bf16.msra.mxu1 %v3603_v45 }
 0x501   : > { %3605 = vmatprep.subr.bf16.mxu1 %v4006_v24 }
 0x504   : > { %3607 = vmatpush3.bf16.msra.mxu1 %v3606_v47 }
 0x505   : > { %3608 = vmatprep.subr.bf16.mxu1 %v4006_v24 }
 0x508   : > { %3610 = vmatpush3.bf16.msra.mxu1 %v3609_v5 }
 0x509   : > { %3611 = vmatprep.subr.bf16.mxu1 %v4006_v24 }
 0x50c   : > { %3613 = vmatpush3.bf16.msra.mxu1 %v3612_v12 }
 0x50d   : > { %3614 = vmatprep.subr.bf16.mxu1 %v4006_v24 }
 0x5d2   : > { %v1400_v55 = vpop.f32.mrb[4].mxu1 }
 0x5d3   : > { %v1404_v56 = vadd.f32 %v1400_v55, %v4147_v13  ;;  %v3293_v57 = vpop.f32.mrb[5].mxu1  ;;  %v1437_v13 = vld [vmem:[%s4730_s5 + $0x8] sm:$0xff] }
 0x5d4   : > { %v3555_v1 = vpack.c.bf16 %v1437_v13, %v1436_v0  ;;  %v1671_v55 = vld [vmem:[%s4730_s5 + $0x68] sm:$0xff]  ;;  %v1750_v13 = vld [vmem:[%s4730_s5 + $0x90] sm:$0xff] }
 0x5d5   : > { %v1407_v58 = vsel %vm391_vm0, %v1404_v56, 0.0 }
 0x5d6   : > { %1408 = vadd.xlane.f32.xlu0 %v1407_v58  ;;  %3556 = vmatpush3.bf16.msra.mxu0 %v3555_v1  ;;  %v1672_v58 = vld [vmem:[%s4730_s5 + $0x70] sm:$0xff]  ;;  %v1751_v1 = vld [vmem:[%s4730_s5 + $0x98] sm:$0xff] }
 0x5d7   : > { %3557 = vmatprep.subr.bf16.mxu0 %v4006_v24  ;;  %v3582_v2 = vpack.c.bf16 %v1751_v1, %v1750_v13 }
 0x5da   : > { %3559 = vmatpush3.bf16.msra.mxu0 %v3558_v4  ;;  %v1827_v4 = vld [vmem:[%s4730_s5 + $0xa8] sm:$0xff] }
 0x5db   : > { %3560 = vmatprep.subr.bf16.mxu0 %v4006_v24 }
 0x5ec   : > { %3779 = vrot.lane.b32.xlu0 %v3778_v9, %s4739_s12 }
 0x5f0   : > { %3789 = vrot.lane.b32.xlu0 %v3788_v11, %s4739_s12 }
 0x5f4   : > { %3799 = vrot.lane.b32.xlu0 %v3778_v9, %s4749_s30 }
 0x5f8   : > { %3809 = vrot.lane.b32.xlu0 %v3788_v11, %s4749_s30 }
 0x5fc   : > { %3819 = vrot.lane.b32.xlu0 %v3778_v9, %s4741_s29  ;;  %v3585_v9 = vpack.c.bf16 %v1827_v4, %v1826_v3 }
 0x600   : > { %3829 = vrot.lane.b32.xlu0 %v3788_v11, %s4741_s29 }
 0x604   : > { %3839 = vrot.lane.b32.xlu0 %v3838_v21, %s4750_s25 }
 0x608   : > { %3849 = vrot.lane.b32.xlu0 %v3848_v28, %s4750_s25 }
 0x60c   : > { %3859 = vrot.lane.b32.xlu0 %v3838_v21, %s4749_s30 }
 0x610   : > { %3869 = vrot.lane.b32.xlu0 %v3843_v27, %s4749_s30 }
 0x614   : > { %3879 = vrot.lane.b32.xlu0 %v3848_v28, %s4749_s30 }
 0x618   : > { %3889 = vrot.lane.b32.xlu0 %v3853_v31, %s4749_s30 }
 0x663   : > { %v1409_v59 = vpop.xlane.xlu0 %1408 }
 0x664   : > { %v1411_v60 = vmul.f32 0.03125, %v1409_v59  ;;  %v1673_v59 = vld [vmem:[%s4730_s5 + $0x78] sm:$0xff] }
 0x666   : > { %v4256_v61 = vsub.f32 %v1404_v56, %v1411_v60  ;;  %v3573_v56 = vpack.c.bf16 %v1671_v55, %v1670_v54  ;;  %v3576_v60 = vpack.c.bf16 %v1673_v59, %v1672_v58 }
 0x667   : > { %v3780_v8 = vpop.permute.xlu0 %3779 }
 0x668   : > { %v1413_v62 = vmul.f32 %v4256_v61, %v4256_v61 }
 0x66a   : > { %v1414_v63 = vsel %vm391_vm0, %v1413_v62, 0.0  ;;  %v1749_v62 = vld [vmem:[%s4730_s5 + $0x88] sm:$0xff] }
 0x66b   : > { %1415 = vadd.xlane.f32.xlu1 %v1414_v63  ;;  %v4558_v10 = vpop.permute.xlu0 %3789 }
 0x67c   : > { %3784 = vrot.lane.b32.xlu1 %v3783_v15, %s4739_s12 }
 0x680   : > { %3794 = vrot.lane.b32.xlu1 %v3793_v18, %s4739_s12 }
 0x684   : > { %3804 = vrot.lane.b32.xlu1 %v3783_v15, %s4749_s30 }
 0x688   : > { %3814 = vrot.lane.b32.xlu1 %v3793_v18, %s4749_s30 }
 0x68c   : > { %3824 = vrot.lane.b32.xlu1 %v3783_v15, %s4741_s29  ;;  %v1828_v15 = vld [vmem:[%s4730_s5 + $0xb0] sm:$0xff] }
 0x690   : > { %3834 = vrot.lane.b32.xlu1 %v3793_v18, %s4741_s29  ;;  %v1829_v18 = vld [vmem:[%s4730_s5 + $0xb8] sm:$0xff] }
 0x694   : > { %3844 = vrot.lane.b32.xlu1 %v3843_v27, %s4750_s25 }
 0x698   : > { %3854 = vrot.lane.b32.xlu1 %v3853_v31, %s4750_s25 }
 0x69c   : > { %3864 = vrot.lane.b32.xlu1 %v3838_v21, %s4741_s29  ;;  %v3588_v21 = vpack.c.bf16 %v1829_v18, %v1828_v15 }
 0x6a0   : > { %3874 = vrot.lane.b32.xlu1 %v3843_v27, %s4741_s29  ;;  %v1904_v27 = vld [vmem:[%s4730_s5 + $0xc0] sm:$0xff] }
 0x6a4   : > { %3884 = vrot.lane.b32.xlu1 %v3848_v28, %s4741_s29  ;;  %v1905_v28 = vld [vmem:[%s4730_s5 + $0xc8] sm:$0xff] }
 0x6a8   : > { %3894 = vrot.lane.b32.xlu1 %v3853_v31, %s4741_s29  ;;  %v3591_v31 = vpack.c.bf16 %v1905_v28, %v1904_v27 }
 0x6f8   : > { %v1416_v32 = vpop.xlane.xlu1 %1415 }
 0x6f9   : > { %v1417_v33 = vmul.f32 0.03125, %v1416_v32 }
 0x6fb   : > { %v1418_v34 = vadd.f32 1e-05, %v1417_v33  ;;  %v1906_v33 = vld [vmem:[%s4730_s5 + $0xd0] sm:$0xff] }
 0x6fd   : > { %3906 = vrsqrt.f32 %v1418_v34  ;;  %v1907_v34 = vld [vmem:[%s4730_s5 + $0xd8] sm:$0xff] }
 0x707   : > { %v3907_v35 = vpop.eup %3906 }
 0x708   : > { %v1420_v37 = vmul.f32 %v3907_v35, %v4256_v61  ;;  %v1748_v61 = vld [vmem:[%s4730_s5 + $0x80] sm:$0xff]  ;;  %v3594_v35 = vpack.c.bf16 %v1907_v34, %v1906_v33  ;;  %v3792_v33 = vunpack.i.h.bf16 %v4558_v10  ;;  %v3791_v34 = vunpack.i.l.bf16 %v4558_v10 }
 0x709   : > { %v3579_v63 = vpack.c.bf16 %v1749_v62, %v1748_v61 }
 0x70a   : > { %v1427_v41 = vmul.f32 %v3060_v36, %v1420_v37  ;;  %v1982_v36 = vld [vmem:[%s4730_s5 + $0xe0] sm:$0xff]  ;;  %v1983_v37 = vld [vmem:[%s4730_s5 + $0xe8] sm:$0xff] }
 0x70b   : > { %v3597_v38 = vpack.c.bf16 %v1983_v37, %v1982_v36 }
 0x70c   : > { %v4408_v43 = vadd.f32 %v3061_v40, %v1427_v41  ;;  %v1984_v40 = vld [vmem:[%s4730_s5 + $0xf0] sm:$0xff]  ;;  %v1985_v41 = vld [vmem:[%s4730_s5 + $0xf8] sm:$0xff] }
 0x70e   : > { %3303 = vmatmul.mubr.msk.f32.vlgmr.msra.gmra.mrb[8].mxu0 %vm391_vm0, %v4408_v43  ;;  %v1518_v50 = vrot.slane %v4408_v43, 1  ;;  %v1596_v57 = vrot.slane %v4408_v43, 2  ;;  %v1674_v0 = vrot.slane %v4408_v43, 3  ;;  %v1752_v11 = vrot.slane %v4408_v43, 4 }
 0x70f   : > { %3562 = vmatpush3.bf16.msra.mxu0 %v3561_v42  ;;  %3313 = vmatprep.mubr.msk.f32.mxu0 %vm3993_vm1, %v3992_v7  ;;  %v1830_v32 = vrot.slane %v4408_v43, 5  ;;  %v1908_v39 = vrot.slane %v4408_v43, 6  ;;  %v3600_v42 = vpack.c.bf16 %v1985_v41, %v1984_v40  ;;  %v1986_v44 = vrot.slane %v4408_v43, 7 }
 0x710   : > { %3563 = vmatprep.subr.bf16.mxu0 %v4006_v24  ;;  %v3621_v41 = vpack.c.bf16 %v3792_v33, %v3791_v34 }
 0x713   : > { %3565 = vmatpush3.bf16.msra.mxu0 %v3564_v46  ;;  %v3651_v46 = vpack.c.bf16 %v4340_v20, %v4335_v19  ;;  %v4560_v19 = vpop.permute.xlu0 %3799  ;;  %v2193_v20 = vlaneseq }
 0x714   : > { %3566 = vmatprep.subr.bf16.mxu0 %v4006_v24  ;;  %v3801_v5 = vunpack.i.l.bf16 %v4560_v19 }
 0x715   : > { %v2194_v23 = vshrl.u32 %v2193_v20, 7 }
 0x716   : > { %3314 = vmatmul.mubr.msk.f32.vlgmr.msra.gmra.mrb[8].mxu0 %vm391_vm0, %v1518_v50  ;;  %v1435_v50 = vld [vmem:[%s4731_s6] sm:$0x1] }
 0x717   : > { %3568 = vmatpush3.bf16.msra.mxu0 %v3567_v49  ;;  %3324 = vmatprep.mubr.msk.f32.mxu0 %vm3993_vm1, %v3992_v7  ;;  %v4562_v22 = vpop.permute.xlu0 %3809  ;;  %v2195_v17 = vsub.s32 0, %v2194_v23 }
 0x718   : > { %3569 = vmatprep.subr.bf16.mxu0 %v4006_v24  ;;  %v3811_v23 = vunpack.i.l.bf16 %v4562_v22 }
 0x719   : > { %v2196_v25 = vrot.slane %v4567_v16, %v2195_v17  ;;  %v2615_v30 = vrot.slane %v4573_v26, %v2195_v17 }
 0x71b   : > { %3571 = vmatpush3.bf16.msra.mxu0 %v3570_v53  ;;  %v4575_v29 = vpop.permute.xlu0 %3819  ;;  %2197 = vrot.lane.b32.xlu0 %v2196_v25, %s4750_s25 }
 0x71c   : > { %3572 = vmatprep.subr.bf16.mxu0 %v4006_v24  ;;  %2303 = vrot.lane.b32.xlu1 %v2196_v25, %s4749_s30 }
 0x71e   : > { %3325 = vmatmul.mubr.msk.f32.vlgmr.msra.gmra.mrb[8].mxu0 %vm391_vm0, %v1596_v57 }
 0x71f   : > { %3574 = vmatpush3.bf16.msra.mxu0 %v3573_v56  ;;  %3335 = vmatprep.mubr.msk.f32.mxu0 %vm3993_vm1, %v3992_v7  ;;  %v4582_v49 = vpop.permute.xlu0 %3829 }
 0x720   : > { %3575 = vmatprep.subr.bf16.mxu0 %v4006_v24  ;;  %2409 = vrot.lane.b32.xlu0 %v2196_v25, %s4751_s13 }
 0x721   : > { %2616 = vrot.lane.b32.xlu1 %v2615_v30, %s4750_s25 }
 0x723   : > { %3577 = vmatpush3.bf16.msra.mxu0 %v3576_v60  ;;  %v4589_v52 = vpop.permute.xlu0 %3839 }
 0x724   : > { %3578 = vmatprep.subr.bf16.mxu0 %v4006_v24  ;;  %2722 = vrot.lane.b32.xlu0 %v2615_v30, %s4749_s30  ;;  %s375_s30 = sand.u32 1, %s3982_s18  }
 0x725   : > { %2828 = vrot.lane.b32.xlu1 %v2615_v30, %s4751_s13  ;;  %s3046_s25 = sshll.u32 %s375_s30, 3  ;;  %s2970_s1 = scalar_lea.sflag [#allocation4], %s375_s30 }
 0x726   : > { %3336 = vmatmul.mubr.msk.f32.vlgmr.msra.gmra.mrb[8].mxu0 %vm391_vm0, %v1674_v0  ;;  %v3781_v0 = vunpack.i.l.bf16 %v3780_v8  ;;  %s377_s29 = scalar_lea.vmem [#allocation3], %s3046_s25  ;;  %s3932_s25 = sshll.u32 %s4007_s21, 4  ;;  %s3933_s25 = int_to_ptr.vmem [resolvable:$false] %s3932_s25 }
 0x727   : > { %3580 = vmatpush3.bf16.msra.mxu0 %v3579_v63  ;;  %3346 = vmatprep.mubr.msk.f32.mxu0 %vm3993_vm1, %v3992_v7  ;;  %v4591_v57 = vpop.permute.xlu0 %3849  ;;  %v3782_v63 = vunpack.i.h.bf16 %v3780_v8  ;;  %s2983_s22 = sshll.u32 %s377_s29, 4  ;;  %s3934_s16 = scalar_lea.vmem %s3933_s25, 256  ;;  %s4684_s22 = int_to_ptr.vmem [resolvable:$true] %s2983_s22 }
 0x728   : > { %3581 = vmatprep.subr.bf16.mxu0 %v4006_v24  ;;  %s3928_s15 = scalar_lea.vmem %s4684_s22, 128  ;;  %p3935_p0 = scmp.lt.s32.totalorder %s4684_s22, %s3933_s25 }
 0x729   : > { %v3615_v4 = vpack.c.bf16 %v3782_v63, %v3781_v0  ;;  %p3929_p11 = scmp.ne.s32.totalorder %s4684_s22, %s3928_s15  ;;  %p3936_p1 = scmp.lt.s32.totalorder %s3934_s16, %s3928_s15 }
 0x72b   : > { %3583 = vmatpush3.bf16.msra.mxu0 %v3582_v2  ;;  %v3860_v61 = vpop.permute.xlu0 %3859  ;;  %v3785_v2 = vpop.permute.xlu1 %3784  ;;  %p3930_p12 = pnand %p3929_p11, %p4106_p5  ;;  %p3937_p2 = por %p3936_p1, %p3935_p0 }
 0x72c   : > { %3584 = vmatprep.subr.bf16.mxu0 %v4006_v24  ;;  %v3862_v13 = vunpack.i.h.bf16 %v3860_v61  ;;  %v3861_v1 = vunpack.i.l.bf16 %v3860_v61  ;;  %v3786_v27 = vunpack.i.l.bf16 %v3785_v2  ;;  %v3831_v61 = vunpack.i.l.bf16 %v4582_v49 }
 0x72d   : > { %p3931_p13 = pneg %p3930_p12 }
 0x72e   : > { %3347 = vmatmul.mubr.msk.f32.vlgmr.msra.gmra.mrb[8].mxu0 %vm391_vm0, %v1752_v11  ;;  %v3675_v15 = vpack.c.bf16 %v3862_v13, %v3861_v1 }
 0x72f   : > { %3586 = vmatpush3.bf16.msra.mxu0 %v3585_v9  ;;  %3357 = vmatprep.mubr.msk.f32.mxu0 %vm3993_vm1, %v3992_v7  ;;  %v3870_v62 = vpop.permute.xlu0 %3869  ;;  %p3938_p3 = pnand %p3937_p2, %p3931_p13 }
 0x730   : > { %3587 = vmatprep.subr.bf16.mxu0 %v4006_v24  ;;  %v3872_v28 = vunpack.i.h.bf16 %v3870_v62 }
 0x733   : > { %3589 = vmatpush3.bf16.msra.mxu0 %v3588_v21  ;;  %v3880_v18 = vpop.permute.xlu0 %3879  ;;  %v3787_v21 = vunpack.i.h.bf16 %v3785_v2  ;;  %v3842_v2 = vunpack.i.h.bf16 %v4589_v52 }
 0x734   : > { %3590 = vmatprep.subr.bf16.mxu0 %v4006_v24  ;;  %v3882_v37 = vunpack.i.h.bf16 %v3880_v18 }
 0x736   : > { %3358 = vmatmul.mubr.msk.f32.vlgmr.msra.gmra.mrb[8].mxu0 %vm391_vm0, %v1830_v32 }
 0x737   : > { %3592 = vmatpush3.bf16.msra.mxu0 %v3591_v31  ;;  %3368 = vmatprep.mubr.msk.f32.mxu0 %vm3993_vm1, %v3992_v7  ;;  %v3871_v31 = vunpack.i.l.bf16 %v3870_v62  ;;  %v3890_v40 = vpop.permute.xlu0 %3889 }
 0x738   : > { %3593 = vmatprep.subr.bf16.mxu0 %v4006_v24  ;;  %v3891_v47 = vunpack.i.l.bf16 %v3890_v40 }
 0x739   : > { %v3678_v36 = vpack.c.bf16 %v3872_v28, %v3871_v31 }
 0x73b   : > { %3595 = vmatpush3.bf16.msra.mxu0 %v3594_v35  ;;  %v3618_v35 = vpack.c.bf16 %v3787_v21, %v3786_v27  ;;  %v3852_v21 = vunpack.i.h.bf16 %v4591_v57  ;;  %v3851_v27 = vunpack.i.l.bf16 %v4591_v57 }
 0x73c   : > { %3596 = vmatprep.subr.bf16.mxu0 %v4006_v24 }
 0x73d   : > { %v3669_v28 = vpack.c.bf16 %v3852_v21, %v3851_v27 }
 0x73e   : > { %3369 = vmatmul.mubr.msk.f32.vlgmr.msra.gmra.mrb[8].mxu0 %vm391_vm0, %v1908_v39  ;;  %v3795_v39 = vpop.permute.xlu1 %3794 }
 0x73f   : > { %3598 = vmatpush3.bf16.msra.mxu0 %v3597_v38  ;;  %3379 = vmatprep.mubr.msk.f32.mxu0 %vm3993_vm1, %v3992_v7  ;;  %v3881_v38 = vunpack.i.l.bf16 %v3880_v18  ;;  %v3796_v45 = vunpack.i.l.bf16 %v3795_v39 }
 0x740   : > { %3599 = vmatprep.subr.bf16.mxu0 %v4006_v24 }
 0x743   : > { %3601 = vmatpush3.bf16.msra.mxu0 %v3600_v42  ;;  %v3797_v42 = vunpack.i.h.bf16 %v3795_v39 }
 0x744   : > { %3650 = vmatprep.subr.bf16.mxu0 %v4006_v24 }
 0x746   : > { %3380 = vmatmul.mubr.msk.f32.vlgmr.msra.gmra.mrb[8].mxu0 %vm391_vm0, %v1986_v44  ;;  %v3681_v44 = vpack.c.bf16 %v3882_v37, %v3881_v38 }
 0x747   : > { %3474 = vmatprep.mubr.msk.f32.mxu0 %vm3993_vm1, %v3992_v7  ;;  %3652 = vmatpush3.bf16.msra.mxu0 %v3651_v46  ;;  %v3892_v46 = vunpack.i.h.bf16 %v3890_v40 }
 0x748   : > { %3653 = vmatprep.subr.bf16.mxu0 %v4006_v24 }
 0x749   : > { %v3684_v12 = vpack.c.bf16 %v3892_v46, %v3891_v47 }
 0x74b   : > { %3655 = vmatpush3.bf16.msra.mxu0 %v3654_v48  ;;  %v3802_v48 = vunpack.i.h.bf16 %v4560_v19  ;;  %v3812_v19 = vunpack.i.h.bf16 %v4562_v22 }
 0x74c   : > { %3656 = vmatprep.subr.bf16.mxu0 %v4006_v24 }
 0x74d   : > { %v3627_v8 = vpack.c.bf16 %v3802_v48, %v3801_v5  ;;  %v3633_v30 = vpack.c.bf16 %v3812_v19, %v3811_v23 }
 0x74f   : > { %3658 = vmatpush3.bf16.msra.mxu0 %v3657_v6  ;;  %v3624_v6 = vpack.c.bf16 %v3797_v42, %v3796_v45 }
 0x750   : > { %3659 = vmatprep.subr.bf16.mxu0 %v4006_v24 }
 0x753   : > { %3661 = vmatpush3.bf16.msra.mxu0 %v3660_v14  ;;  %v3805_v14 = vpop.permute.xlu1 %3804 }
 0x754   : > { %3674 = vmatprep.subr.bf16.mxu0 %v4006_v24  ;;  %v3807_v10 = vunpack.i.h.bf16 %v3805_v14  ;;  %v3806_v20 = vunpack.i.l.bf16 %v3805_v14 }
 0x756   : > { %v3630_v17 = vpack.c.bf16 %v3807_v10, %v3806_v20 }
 0x757   : > { %v3815_v25 = vpop.permute.xlu1 %3814 }
 0x75b   : > { %v3825_v22 = vpop.permute.xlu1 %3824 }
 0x78d   : > { %v2198_v23 = vpop.permute.xlu0 %2197 }
 0x819   : > { %v2055_v51 = vpop.f32.mrb[8].mxu0 }
 0x81a   : > { %v3699_v53 = vadd.f32 %v2055_v51, %v1435_v50  ;;  %v3381_v54 = vpop.f32.mrb[9].mxu0  ;;  %v3817_v50 = vunpack.i.h.bf16 %v3815_v25  ;;  %v3816_v51 = vunpack.i.l.bf16 %v3815_v25 }
 0x81b   : > { %v3821_v54 = vunpack.i.l.bf16 %v4575_v29 }
 0x81c   : > { %v2061_v55 = vmul.f32 0.044715, %v3699_v53  ;;  %v2060_v9 = vmul.f32 0.5, %v3699_v53 }
 0x81e   : > { %v2062_v56 = vmul.f32 %v3699_v53, %v2061_v55  ;;  %v3636_v55 = vpack.c.bf16 %v3817_v50, %v3816_v51 }
 0x820   : > { %v2063_v58 = vmul.f32 %v3699_v53, %v2062_v56 }
 0x822   : > { %v2064_v59 = vadd.f32 %v3699_v53, %v2063_v58  ;;  %v3822_v53 = vunpack.i.h.bf16 %v4575_v29  ;;  %v3827_v58 = vunpack.i.h.bf16 %v3825_v22  ;;  %v3835_v29 = vpop.permute.xlu1 %3834 }
 0x823   : > { %v3837_v0 = vunpack.i.h.bf16 %v3835_v29  ;;  %v3836_v13 = vunpack.i.l.bf16 %v3835_v29 }
 0x824   : > { %v2065_v60 = vmul.f32 0.7978846, %v2064_v59  ;;  %v3639_v56 = vpack.c.bf16 %v3822_v53, %v3821_v54  ;;  %v3826_v59 = vunpack.i.l.bf16 %v3825_v22 }
 0x826   : > { %3908 = vtanh.f32 %v2065_v60  ;;  %v3832_v60 = vunpack.i.h.bf16 %v4582_v49  ;;  %v3642_v62 = vpack.c.bf16 %v3827_v58, %v3826_v59  ;;  %v3845_v1 = vpop.permute.xlu1 %3844  ;;  %v3648_v49 = vpack.c.bf16 %v3837_v0, %v3836_v13 }
 0x828   : > { %v3645_v63 = vpack.c.bf16 %v3832_v60, %v3831_v61 }
 0x830   : > { %v3909_v3 = vpop.eup %3908 }
 0x831   : > { %v2067_v11 = vadd.f32 1.0, %v3909_v3  ;;  %v3841_v3 = vunpack.i.l.bf16 %v4589_v52 }
 0x833   : > { %v4593_v32 = vmul.f32 %v2067_v11, %v2060_v9  ;;  %v3663_v9 = vpack.c.bf16 %v3842_v2, %v3841_v3  ;;  %v3847_v11 = vunpack.i.h.bf16 %v3845_v1 }
 0x835   : > { %3399 = vmatmul.mubr.msk.f32.vlgmr.msra.gmra.mrb[6].mxu1 %vm467_vm2, %v4593_v32  ;;  %3475 = vmatmul.mubr.msk.f32.vlgmr.msra.gmra.mrb[10].mxu0 %vm467_vm2, %v4593_v32 }
 0x836   : > { %3616 = vmatpush3.bf16.msra.mxu1 %v3615_v4  ;;  %3676 = vmatpush3.bf16.msra.mxu0 %v3675_v15  ;;  %v3855_v4 = vpop.permute.xlu1 %3854  ;;  %v3846_v15 = vunpack.i.l.bf16 %v3845_v1  ;;  %v2410_v1 = vpop.permute.xlu0 %2409 }
 0x837   : > { %3617 = vmatprep.subr.bf16.mxu1 %v4006_v24  ;;  %3677 = vmatprep.subr.bf16.mxu0 %v4006_v24  ;;  %v3857_v31 = vunpack.i.h.bf16 %v3855_v4  ;;  %v3856_v33 = vunpack.i.l.bf16 %v3855_v4 }
 0x838   : > { %3417 = vmatprep.mubr.msk.f32.mxu1 %vm3993_vm1, %v3992_v7  ;;  %3512 = vmatprep.mubr.msk.f32.mxu0 %vm3993_vm1, %v3992_v7  ;;  %v3666_v52 = vpack.c.bf16 %v3847_v11, %v3846_v15 }
 0x83a   : > { %3619 = vmatpush3.bf16.msra.mxu1 %v3618_v35  ;;  %3679 = vmatpush3.bf16.msra.mxu0 %v3678_v36  ;;  %v3865_v18 = vpop.permute.xlu1 %3864  ;;  %v3672_v35 = vpack.c.bf16 %v3857_v31, %v3856_v33 }
 0x83b   : > { %3620 = vmatprep.subr.bf16.mxu1 %v4006_v24  ;;  %3680 = vmatprep.subr.bf16.mxu0 %v4006_v24  ;;  %v3867_v36 = vunpack.i.h.bf16 %v3865_v18  ;;  %v3866_v37 = vunpack.i.l.bf16 %v3865_v18 }
 0x83d   : > { %v3687_v38 = vpack.c.bf16 %v3867_v36, %v3866_v37 }
 0x83e   : > { %3622 = vmatpush3.bf16.msra.mxu1 %v3621_v41  ;;  %3682 = vmatpush3.bf16.msra.mxu0 %v3681_v44  ;;  %v3875_v34 = vpop.permute.xlu1 %3874 }
 0x83f   : > { %3623 = vmatprep.subr.bf16.mxu1 %v4006_v24  ;;  %3683 = vmatprep.subr.bf16.mxu0 %v4006_v24  ;;  %v3877_v39 = vunpack.i.h.bf16 %v3875_v34  ;;  %v3876_v40 = vunpack.i.l.bf16 %v3875_v34 }
 0x841   : > { %v3690_v41 = vpack.c.bf16 %v3877_v39, %v3876_v40 }
 0x842   : > { %3625 = vmatpush3.bf16.msra.mxu1 %v3624_v6  ;;  %3685 = vmatpush3.bf16.msra.mxu0 %v3684_v12  ;;  %v3885_v57 = vpop.permute.xlu1 %3884 }
 0x843   : > { %3626 = vmatprep.subr.bf16.mxu1 %v4006_v24  ;;  %v3887_v42 = vunpack.i.h.bf16 %v3885_v57  ;;  %v3886_v44 = vunpack.i.l.bf16 %v3885_v57 }
 0x845   : > { %3418 = vmatmul.mubr.msk.f32.vlgmr.msra.gmra.mrb[8].mxu1 %vm467_vm2, %v4593_v32  ;;  %3513 = vmatmul.mubr.msk.f32.vlgmr.msra.gmra.mrb[12].mxu0 %vm467_vm2, %v4593_v32  ;;  %v3693_v46 = vpack.c.bf16 %v3887_v42, %v3886_v44 }
 0x846   : > { %3628 = vmatpush3.bf16.msra.mxu1 %v3627_v8  ;;  %3436 = vmatprep.mubr.msk.f32.mxu1 %vm3993_vm1, %v3992_v7  ;;  %v3895_v45 = vpop.permute.xlu1 %3894 }
 0x847   : > { %3629 = vmatprep.subr.bf16.mxu1 %v4006_v24  ;;  %v3897_v47 = vunpack.i.h.bf16 %v3895_v45  ;;  %v3896_v48 = vunpack.i.l.bf16 %v3895_v45 }
 0x849   : > { %v3696_v5 = vpack.c.bf16 %v3897_v47, %v3896_v48 }
 0x84a   : > { %3631 = vmatpush3.bf16.msra.mxu1 %v3630_v17  ;;  %v2304_v58 = vpop.permute.xlu1 %2303 }
 0x84b   : > { %3632 = vmatprep.subr.bf16.mxu1 %v4006_v24 }
 0x84e   : > { %3634 = vmatpush3.bf16.msra.mxu1 %v3633_v30 }
 0x84f   : > { %3635 = vmatprep.subr.bf16.mxu1 %v4006_v24 }
 0x852   : > { %3637 = vmatpush3.bf16.msra.mxu1 %v3636_v55 }
 0x853   : > { %3638 = vmatprep.subr.bf16.mxu1 %v4006_v24 }
 0x855   : > { %3437 = vmatmul.mubr.msk.f32.vlgmr.msra.gmra.mrb[10].mxu1 %vm467_vm2, %v4593_v32 }
 0x856   : > { %3640 = vmatpush3.bf16.msra.mxu1 %v3639_v56  ;;  %3455 = vmatprep.mubr.msk.f32.mxu1 %vm3993_vm1, %v3992_v7 }
 0x857   : > { %3641 = vmatprep.subr.bf16.mxu1 %v4006_v24 }
 0x85a   : > { %3643 = vmatpush3.bf16.msra.mxu1 %v3642_v62 }
 0x85b   : > { %3644 = vmatprep.subr.bf16.mxu1 %v4006_v24 }
 0x85e   : > { %3646 = vmatpush3.bf16.msra.mxu1 %v3645_v63 }
 0x85f   : > { %3647 = vmatprep.subr.bf16.mxu1 %v4006_v24 }
 0x862   : > { %3649 = vmatpush3.bf16.msra.mxu1 %v3648_v49 }
 0x863   : > { %3662 = vmatprep.subr.bf16.mxu1 %v4006_v24 }
 0x865   : > { %3456 = vmatmul.mubr.msk.f32.vlgmr.msra.gmra.mrb[12].mxu1 %vm467_vm2, %v4593_v32 }
 0x866   : > { %3664 = vmatpush3.bf16.msra.mxu1 %v3663_v9  ;;  %3493 = vmatprep.mubr.msk.f32.mxu1 %vm3993_vm1, %v3992_v7 }
 0x867   : > { %3665 = vmatprep.subr.bf16.mxu1 %v4006_v24 }
 0x86a   : > { %3667 = vmatpush3.bf16.msra.mxu1 %v3666_v52 }
 0x86b   : > { %3668 = vmatprep.subr.bf16.mxu1 %v4006_v24 }
 0x86e   : > { %3670 = vmatpush3.bf16.msra.mxu1 %v3669_v28  ;;  %v2723_v28 = vpop.permute.xlu0 %2722 }
 0x86f   : > { %3671 = vmatprep.subr.bf16.mxu1 %v4006_v24 }
 0x872   : > { %3673 = vmatpush3.bf16.msra.mxu1 %v3672_v35 }
 0x873   : > { %3686 = vmatprep.subr.bf16.mxu1 %v4006_v24 }
 0x875   : > { %3494 = vmatmul.mubr.msk.f32.vlgmr.msra.gmra.mrb[14].mxu1 %vm467_vm2, %v4593_v32 }
 0x876   : > { %3688 = vmatpush3.bf16.msra.mxu1 %v3687_v38  ;;  %3531 = vmatprep.mubr.msk.f32.mxu1 %vm3993_vm1, %v3992_v7 }
 0x877   : > { %3689 = vmatprep.subr.bf16.mxu1 %v4006_v24 }
 0x87a   : > { %3691 = vmatpush3.bf16.msra.mxu1 %v3690_v41 }
 0x87b   : > { %3692 = vmatprep.subr.bf16.mxu1 %v4006_v24 }
 0x87e   : > { %3694 = vmatpush3.bf16.msra.mxu1 %v3693_v46 }
 0x87f   : > { %3695 = vmatprep.subr.bf16.mxu1 %v4006_v24 }
 0x882   : > { %3697 = vmatpush3.bf16.msra.mxu1 %v3696_v5 }
 0x885   : > { %3532 = vmatmul.mubr.msk.f32.vlgmr.msra.gmra.mrb[16].mxu1 %vm467_vm2, %v4593_v32 }
 0x908   : > { %v2147_v6 = vpop.f32.mrb[6].mxu1  ;;  %v2566_v12 = vpop.f32.mrb[10].mxu0 }
 0x909   : > { %v3400_v7 = vpop.f32.mrb[7].mxu1  ;;  %v3476_v14 = vpop.f32.mrb[11].mxu0  ;;  %v2148_v8 = vadd.f32 %v2147_v6, %v4567_v16  ;;  %v2567_v16 = vadd.f32 %v2566_v12, %v4573_v26 }
 0x90a   : > { %v2617_v7 = vpop.permute.xlu1 %2616 }
 0x90b   : > { %v2152_v10 = vmul.f32 0.044715, %v2148_v8  ;;  %v2571_v29 = vmul.f32 0.044715, %v2567_v16  ;;  %v2151_v15 = vmul.f32 0.5, %v2148_v8 }
 0x90d   : > { %v2153_v20 = vmul.f32 %v2152_v10, %v2148_v8  ;;  %v2572_v49 = vmul.f32 %v2571_v29, %v2567_v16 }
 0x90f   : > { %v2154_v19 = vmul.f32 %v2153_v20, %v2148_v8  ;;  %v2573_v26 = vmul.f32 %v2572_v49, %v2567_v16 }
 0x911   : > { %v2155_v24 = vadd.f32 %v2154_v19, %v2148_v8  ;;  %v2574_v33 = vadd.f32 %v2573_v26, %v2567_v16 }
 0x913   : > { %v2156_v55 = vmul.f32 0.7978846, %v2155_v24  ;;  %v2575_v38 = vmul.f32 0.7978846, %v2574_v33  ;;  %v2570_v24 = vmul.f32 0.5, %v2567_v16 }
 0x915   : > { %3910 = vtanh.f32 %v2156_v55 }
 0x918   : > { %v2266_v17 = vpop.f32.mrb[8].mxu1  ;;  %v2791_v25 = vpop.f32.mrb[12].mxu0 }
 0x919   : > { %v2267_v30 = vadd.f32 %v2266_v17, %v2198_v23  ;;  %v3419_v50 = vpop.f32.mrb[9].mxu1  ;;  %v3514_v51 = vpop.f32.mrb[13].mxu0  ;;  %v2792_v34 = vadd.f32 %v2791_v25, %v2723_v28 }
 0x91b   : > { %v2271_v53 = vmul.f32 0.044715, %v2267_v30  ;;  %v2270_v4 = vmul.f32 0.5, %v2267_v30  ;;  %v2796_v39 = vmul.f32 0.044715, %v2792_v34 }
 0x91d   : > { %v2272_v54 = vmul.f32 %v2271_v53, %v2267_v30  ;;  %v2797_v44 = vmul.f32 %v2796_v39, %v2792_v34 }
 0x91f   : > { %v2273_v32 = vmul.f32 %v2272_v54, %v2267_v30  ;;  %v3911_v63 = vpop.eup %3910  ;;  %v2798_v6 = vmul.f32 %v2797_v44, %v2792_v34 }
 0x920   : > { %v2158_v3 = vadd.f32 1.0, %v3911_v63 }
 0x921   : > { %v2274_v22 = vadd.f32 %v2273_v32, %v2267_v30  ;;  %v2799_v8 = vadd.f32 %v2798_v6, %v2792_v34 }
 0x922   : > { %v2159_v27 = vmul.f32 %v2158_v3, %v2151_v15 }
 0x923   : > { %v2275_v56 = vmul.f32 0.7978846, %v2274_v22  ;;  %v2800_v25 = vmul.f32 0.7978846, %v2799_v8 }
 0x925   : > { %3912 = vtanh.f32 %v2275_v56 }
 0x928   : > { %v2372_v59 = vpop.f32.mrb[10].mxu1 }
 0x929   : > { %v2373_v60 = vadd.f32 %v2372_v59, %v2304_v58  ;;  %v3438_v61 = vpop.f32.mrb[11].mxu1 }
 0x92a   : > { %v2829_v61 = vpop.permute.xlu1 %2828 }
 0x92b   : > { %v2377_v62 = vmul.f32 0.044715, %v2373_v60  ;;  %v2376_v45 = vmul.f32 0.5, %v2373_v60 }
 0x92d   : > { %v2378_v0 = vmul.f32 %v2377_v62, %v2373_v60 }
 0x92f   : > { %v3913_v13 = vpop.eup %3912  ;;  %v2379_v2 = vmul.f32 %v2378_v0, %v2373_v60 }
 0x930   : > { %v2277_v9 = vadd.f32 1.0, %v3913_v13 }
 0x931   : > { %v2380_v11 = vadd.f32 %v2379_v2, %v2373_v60 }
 0x932   : > { %v2278_v18 = vmul.f32 %v2277_v9, %v2270_v4  ;;  %v2795_v9 = vmul.f32 0.5, %v2792_v34 }
 0x933   : > { %v2381_v21 = vmul.f32 0.7978846, %v2380_v11 }
 0x934   : > { %v2911_v52 = vrot.slane %v2278_v18, 7 }
 0x935   : > { %3914 = vtanh.f32 %v2381_v21 }
 0x936   : > { %v2931_v31 = vsel %vm1309_vm4, %v2159_v27, %v2911_v52  ;;  %3916 = vtanh.f32 %v2575_v38 }
 0x938   : > { %v2478_v35 = vpop.f32.mrb[12].mxu1 }
 0x939   : > { %v2479_v36 = vadd.f32 %v2478_v35, %v2410_v1  ;;  %v3457_v37 = vpop.f32.mrb[13].mxu1 }
 0x93b   : > { %v2483_v57 = vmul.f32 0.044715, %v2479_v36  ;;  %v2482_v54 = vmul.f32 0.5, %v2479_v36 }
 0x93d   : > { %v2484_v40 = vmul.f32 %v2483_v57, %v2479_v36 }
 0x93f   : > { %v3915_v41 = vpop.eup %3914  ;;  %v2485_v42 = vmul.f32 %v2484_v40, %v2479_v36 }
 0x940   : > { %v2383_v46 = vadd.f32 1.0, %v3915_v41  ;;  %v3917_v23 = vpop.eup %3916 }
 0x941   : > { %v2486_v47 = vadd.f32 %v2485_v42, %v2479_v36  ;;  %v2577_v30 = vadd.f32 1.0, %v3917_v23 }
 0x942   : > { %v2384_v48 = vmul.f32 %v2383_v46, %v2376_v45 }
 0x943   : > { %v2487_v5 = vmul.f32 0.7978846, %v2486_v47  ;;  %v2578_v32 = vmul.f32 %v2577_v30, %v2570_v24 }
 0x944   : > { %v2914_v12 = vrot.slane %v2384_v48, 6 }
 0x945   : > { %3918 = vtanh.f32 %v2487_v5  ;;  %v2920_v60 = vrot.slane %v2578_v32, 4 }
 0x946   : > { %v2932_v14 = vsel %vm1311_vm5, %v2931_v31, %v2914_v12  ;;  %3920 = vtanh.f32 %v2800_v25 }
 0x948   : > { %v2685_v10 = vpop.f32.mrb[14].mxu1 }
 0x949   : > { %v2686_v20 = vadd.f32 %v2685_v10, %v2617_v7  ;;  %v3495_v19 = vpop.f32.mrb[15].mxu1  ;;  %v3079_v7 = vld [vmem:[%s4735_s10] ss:$0 sm:$0xff] }
 0x94b   : > { %v2690_v17 = vmul.f32 0.044715, %v2686_v20  ;;  %v2689_v11 = vmul.f32 0.5, %v2686_v20 }
 0x94d   : > { %v2691_v50 = vmul.f32 %v2690_v17, %v2686_v20 }
 0x94f   : > { %v3919_v51 = vpop.eup %3918  ;;  %v2692_v53 = vmul.f32 %v2691_v50, %v2686_v20 }
 0x950   : > { %v2489_v55 = vadd.f32 1.0, %v3919_v51  ;;  %v3921_v16 = vpop.eup %3920 }
 0x951   : > { %v2693_v22 = vadd.f32 %v2692_v53, %v2686_v20  ;;  %v2802_v3 = vadd.f32 1.0, %v3921_v16 }
 0x952   : > { %v2490_v56 = vmul.f32 %v2489_v55, %v2482_v54 }
 0x953   : > { %v2694_v58 = vmul.f32 0.7978846, %v2693_v22  ;;  %v2803_v21 = vmul.f32 %v2802_v3, %v2795_v9 }
 0x954   : > { %v2917_v59 = vrot.slane %v2490_v56, 5 }
 0x955   : > { %3922 = vtanh.f32 %v2694_v58  ;;  %v2926_v28 = vrot.slane %v2803_v21, 2 }
 0x956   : > { %v2933_v62 = vsel %vm1313_vm6, %v2932_v14, %v2917_v59 }
 0x957   : > { %v2934_v29 = vsel %vm1315_vm7, %v2933_v62, %v2920_v60 }
 0x958   : > { %v2897_v63 = vpop.f32.mrb[16].mxu1 }
 0x959   : > { %v2898_v0 = vadd.f32 %v2897_v63, %v2829_v61  ;;  %v3533_v13 = vpop.f32.mrb[17].mxu1 }
 0x95b   : > { %v2902_v1 = vmul.f32 0.044715, %v2898_v0  ;;  %v2901_v36 = vmul.f32 0.5, %v2898_v0 }
 0x95d   : > { %v2903_v2 = vmul.f32 %v2902_v1, %v2898_v0 }
 0x95f   : > { %v3923_v49 = vpop.eup %3922  ;;  %v2904_v4 = vmul.f32 %v2903_v2, %v2898_v0 }
 0x960   : > { %v2696_v15 = vadd.f32 1.0, %v3923_v49 }
 0x961   : > { %v2905_v18 = vadd.f32 %v2904_v4, %v2898_v0 }
 0x962   : > { %v2697_v27 = vmul.f32 %v2696_v15, %v2689_v11 }
 0x963   : > { %v2906_v26 = vmul.f32 0.7978846, %v2905_v18 }
 0x964   : > { %v2923_v52 = vrot.slane %v2697_v27, 3 }
 0x965   : > { %3924 = vtanh.f32 %v2906_v26 }
 0x966   : > { %v2935_v31 = vsel %vm1317_vm8, %v2934_v29, %v2923_v52 }
 0x967   : > { %v2936_v33 = vsel %vm1319_vm9, %v2935_v31, %v2926_v28 }
 0x96f   : > { %v3925_v35 = vpop.eup %3924 }
 0x970   : > { %v2908_v37 = vadd.f32 1.0, %v3925_v35 }
 0x972   : > { %v2909_v57 = vmul.f32 %v2908_v37, %v2901_v36 }
 0x974   : > { %v2929_v38 = vrot.slane %v2909_v57, 1 }
 0x976   : > { %v2937_v34 = vsel %vm1321_vm10, %v2936_v33, %v2929_v38 }
 0x977   : > { %v2938_v39 = vadd.f32 %v2937_v34, %v4408_v43  ;;  %v3078_v43 = vld [vmem:[%s4734_s9] ss:$0 sm:$0xff] }
 0x979   : > { %v2941_v40 = vsel %vm391_vm0, %v2938_v39, 0.0 }
 0x97a   : > { %2942 = vadd.xlane.f32.xlu0 %v2941_v40 }
 0xa07   : > { %v2943_v41 = vpop.xlane.xlu0 %2942 }
 0xa08   : > { %v2944_v42 = vmul.f32 0.03125, %v2943_v41 }
 0xa0a   : > { %v2945_v44 = vsub.f32 %v2938_v39, %v2944_v42 }
 0xa0c   : > { %v2946_v45 = vmul.f32 %v2945_v44, %v2945_v44 }
 0xa0e   : > { %v2947_v46 = vsel %vm391_vm0, %v2946_v45, 0.0 }
 0xa0f   : > { %2948 = vadd.xlane.f32.xlu1 %v2947_v46 }
 0xa9c   : > { %v2949_v47 = vpop.xlane.xlu1 %2948 }
 0xa9d   : > { %v2950_v48 = vmul.f32 0.03125, %v2949_v47 }
 0xa9f   : > { %v2951_v5 = vadd.f32 1e-05, %v2950_v48 }
 0xaa1   : > { %3926 = vrsqrt.f32 %v2951_v5 }
 0xaab   : > { %v3927_v6 = vpop.eup %3926 }
 0xaac   : > { %v2953_v12 = vmul.f32 %v3927_v6, %v2945_v44 }
 0xaae   : > { %v2960_v14 = vmul.f32 %v3078_v43, %v2953_v12 }
 0xab0   : > { %v2967_v8 = vadd.f32 %v3079_v7, %v2960_v14 }
 0xab2   : > { %2968 = vst.msk [vmem:[%s377_s29] sm:$0xff] %vm391_vm0, %v2967_v8 }
 0xab3   : > { %3941 = shalt.err (!%p3938_p3)
}
 0xab4   : > { %s3942_s30 = scalar_lea.hbm %s4682_s0, 128  ;;  %s3946_s29 = scalar_lea.hbm %s4736_s11, 256 }
 0xab5   : > { %p3943_p4 = scmp.ne.s32.totalorder %s4682_s0, %s3942_s30  ;;  %p3947_p9 = scmp.lt.u32.totalorder %s4682_s0, %s4736_s11 }
 0xab6   : > { %p3948_p10 = scmp.lt.u32.totalorder %s3946_s29, %s3942_s30  ;;  %p3950_p12 = scmp.lt.u32.totalorder %s3942_s30, %s4682_s0 }
 0xab7   : > { %p3944_p7 = pnand %p3943_p4, %p4106_p5 }
 0xab8   : > { %p3949_p11 = por %p3948_p10, %p3947_p9 }
 0xab9   : > { %p3945_p8 = pneg %p3944_p7 }
 0xaba   : > { %p3951_p13 = por %p3950_p12, %p3949_p11 }
 0xabc   : > { %p3952_p0 = pnand %p3951_p13, %p3945_p8 }
 0xabe   : > { %3955 = shalt.err (!%p3952_p0)
}
 0xabf   : > { %3724 = dma.vmem_to_hbm [thread:$0]  (%p4106_p5), %s4684_s22, 128, %s4682_s0, %s2970_s1  }
 0xac0 PF: > { %p3730_p1 = scmp.ge.s32.totalorder %s3990_s20, 2  ;;  %s2995_s15 = sand.u32 1, %s3978_s17  }
 0xac1   : > { %s2996_s21 = scalar_lea.sflag [#allocation4], %s2995_s15 }
 0xac2   : > { %p3727_p2 = pnand %p3730_p1, %p4110_p6 }
 0xac4   : > { %3973 = dma.done.wait (!%p3727_p2), %s2996_s21, 128  }
 0xac5   : > { %3975 = vsyncadd (!%p3727_p2), %s2996_s21, 4294967168  ;;  %p21_p3 = scmp.ge.s32.totalorder %s4093_s23, 4   ;;  %s4752_s17 = smov %s3982_s18 }
 0xac6   : > { %s4753_s18 = smov %s3986_s19  ;;  %s4754_s19 = smov %s4104_s26 }
 0xac7   : > { %s4755_s20 = smov %s4093_s23  ;;  %23 = sbr.rel (!%p21_p3) target bundleno = 6 (0x6), region = 99 }
 0xace   :  { %3001 = vsyncpa [#allocation4], 1 }
 0xacf   :  { %3003 = vsyncpa [#allocation4 + $0x1], 1 }

</bundles_post_ra>
